<compile_context>
chip_gen: v7x
topology: tpu7x:2x2x1
jax: 0.10.0
libtpu: 0.0.40
codegen_flags: <defaults>
</compile_context>

<pallas_src>
import jax
import jax.numpy as jnp
from jax.experimental import pallas as pl
from jax.experimental.pallas import tpu as pltpu

IN_DIM = 28 * 28          # 784
IN_PAD = 896              # 7 * 128, lane-aligned K for the first matmul
HIDDEN = 512
OUT_DIM = 10
OUT_PAD = 128             # lane-dense logits path (slice [:, :10] in wrapper)


def mlp_kernel(x_ref, w1_ref, b1_ref, w2_ref, b2_ref, w3_ref, b3_ref, o_ref):
    # Linear(784, 512) + ReLU   (bf16 inputs, f32 accumulation on the MXU)
    h1 = jnp.dot(x_ref[...], w1_ref[...], preferred_element_type=jnp.float32)
    h1 = jnp.maximum(h1 + b1_ref[...], 0.0).astype(jnp.bfloat16)
    # Linear(512, 512) + ReLU
    h2 = jnp.dot(h1, w2_ref[...], preferred_element_type=jnp.float32)
    h2 = jnp.maximum(h2 + b2_ref[...], 0.0).astype(jnp.bfloat16)
    # Linear(512, 10) padded to 128 lanes (zero-padded columns)
    logits = jnp.dot(h2, w3_ref[...], preferred_element_type=jnp.float32)
    o_ref[...] = (logits + b3_ref[...]).astype(o_ref.dtype)


def neural_network_forward(x, params):
    """x: (B, 1, 28, 28) float32 (NCHW, like PyTorch). Returns logits (B, 10) f32."""
    w1, b1, w2, b2, w3, b3 = params
    B = x.shape[0]
    x_flat = x.reshape(B, -1)                      # nn.Flatten(): (B, 784)

    # --- pad / cast for the TPU-friendly layout (zero padding => exact semantics) ---
    # Batch tile: MXU-friendly when B is large, sublane-aligned otherwise.
    TB = 256 if B >= 256 else 8
    B_pad = ((B + TB - 1) // TB) * TB
    n_tiles = B_pad // TB

    x_p = jnp.zeros((B_pad, IN_PAD), jnp.bfloat16)
    x_p = x_p.at[:B, :IN_DIM].set(x_flat.astype(jnp.bfloat16))

    w1_p = jnp.zeros((IN_PAD, HIDDEN), jnp.bfloat16).at[:IN_DIM, :].set(
        w1.astype(jnp.bfloat16))
    w2_p = w2.astype(jnp.bfloat16)
    w3_p = jnp.zeros((HIDDEN, OUT_PAD), jnp.bfloat16).at[:, :OUT_DIM].set(
        w3.astype(jnp.bfloat16))
    # Biases stay f32 (tiny; added to f32 accumulators).
    b1_p = b1.astype(jnp.float32)
    b2_p = b2.astype(jnp.float32)
    b3_p = jnp.zeros((1, OUT_PAD), jnp.float32).at[:, :OUT_DIM].set(
        b3.astype(jnp.float32))

    # --- block specs: x/out tiled over the batch grid, weights VMEM-resident ---
    tiled = lambda shape: pl.BlockSpec(shape, lambda i: (i, 0))
    resident = lambda shape: pl.BlockSpec(shape, lambda i: (0, 0))

    flops = 2 * B_pad * (IN_PAD * HIDDEN + HIDDEN * HIDDEN + HIDDEN * OUT_PAD)
    bytes_accessed = (
        (IN_PAD * HIDDEN + HIDDEN * HIDDEN + HIDDEN * OUT_PAD) * 2   # bf16 weights
        + (2 * HIDDEN + OUT_PAD) * 4                                 # f32 biases
        + B_pad * IN_PAD * 2                                         # bf16 input
        + B_pad * OUT_PAD * 4                                        # f32 output
    )

    out_pad = pl.pallas_call(
        mlp_kernel,
        out_shape=jax.ShapeDtypeStruct((B_pad, OUT_PAD), jnp.float32),
        grid=(n_tiles,),
        in_specs=[
            tiled((TB, IN_PAD)),
            resident((IN_PAD, HIDDEN)),
            resident((1, HIDDEN)),
            resident((HIDDEN, HIDDEN)),
            resident((1, HIDDEN)),
            resident((HIDDEN, OUT_PAD)),
            resident((1, OUT_PAD)),
        ],
        out_specs=tiled((TB, OUT_PAD)),
        compiler_params=pltpu.CompilerParams(
            dimension_semantics=("parallel",),      # megacore sharding on v7x
            vmem_limit_bytes=16 << 20,              # working set is only a few MiB
        ),
        cost_estimate=pl.CostEstimate(
            flops=flops, transcendentals=0, bytes_accessed=bytes_accessed),
    )(x_p, w1_p, b1_p, w2_p, b2_p, w3_p, b3_p)

    return out_pad[:B, :OUT_DIM]


def init_params(key):
    """Deterministic init matching nn.Linear shapes.
    PyTorch stores weight as (out, in); we pre-transpose to (in, out)."""
    ks = jax.random.split(key, 6)

    def linear(kw, kb, fan_in, fan_out):
        bound = 1.0 / jnp.sqrt(fan_in)
        w = jax.random.uniform(kw, (fan_in, fan_out), jnp.float32, -bound, bound)
        b = jax.random.uniform(kb, (1, fan_out), jnp.float32, -bound, bound)
        return w, b

    w1, b1 = linear(ks[0], ks[1], IN_DIM, HIDDEN)
    w2, b2 = linear(ks[2], ks[3], HIDDEN, HIDDEN)
    w3, b3 = linear(ks[4], ks[5], HIDDEN, OUT_DIM)
    return (w1, b1, w2, b2, w3, b3)


if __name__ == "__main__":
    key = jax.random.PRNGKey(0)
    k_x, k_p = jax.random.split(key)
    B = 2
    x = jax.random.normal(k_x, (B, 1, 28, 28), jnp.float32)  # NCHW like MNIST
    params = init_params(k_p)

    logits = neural_network_forward(x, params)
    jax.block_until_ready(logits)

    # Reference 1: f32 reference (module semantics); loose tol due to bf16 weights.
    w1, b1, w2, b2, w3, b3 = params
    xf = x.reshape(B, -1)
    h = jnp.maximum(xf @ w1 + b1, 0.0)
    h = jnp.maximum(h @ w2 + b2, 0.0)
    ref_f32 = h @ w3 + b3

    # Reference 2: same bf16 data path in plain JAX; tight tolerance.
    xb = xf.astype(jnp.bfloat16)
    hb = jnp.maximum(
        jnp.dot(xb, w1.astype(jnp.bfloat16), preferred_element_type=jnp.float32) + b1,
        0.0).astype(jnp.bfloat16)
    hb = jnp.maximum(
        jnp.dot(hb, w2.astype(jnp.bfloat16), preferred_element_type=jnp.float32) + b2,
        0.0).astype(jnp.bfloat16)
    ref_bf16 = jnp.dot(hb, w3.astype(jnp.bfloat16),
                       preferred_element_type=jnp.float32) + b3

    assert logits.shape == (B, OUT_DIM)
    assert jnp.allclose(logits, ref_bf16, atol=1e-3, rtol=1e-3)
    assert jnp.allclose(logits, ref_f32, atol=5e-2, rtol=5e-2)
    print("KERNEL_OK")
</pallas_src>

<mosaic_0001>
module attributes {stable_mosaic.version = 11 : i64} {
  func.func @mlp_kernel(%arg0: i32, %arg1: memref<8x896xbf16, #tpu.memory_space<vmem>>, %arg2: memref<896x512xbf16, #tpu.memory_space<vmem>>, %arg3: memref<1x512xf32, #tpu.memory_space<vmem>>, %arg4: memref<512x512xbf16, #tpu.memory_space<vmem>>, %arg5: memref<1x512xf32, #tpu.memory_space<vmem>>, %arg6: memref<512x128xbf16, #tpu.memory_space<vmem>>, %arg7: memref<1x128xf32, #tpu.memory_space<vmem>>, %arg8: memref<8x128xf32, #tpu.memory_space<vmem>>) attributes {dimension_semantics = [#tpu.dimension_semantics<parallel>], iteration_bounds = array<i64: 1>, scalar_prefetch = 0 : i64, scratch_operands = 0 : i64, tpu.core_type = #tpu.core_type<tc>, window_params = [{transform_indices = @transform_0, window_bounds = array<i64: 8, 896>}, {pipeline_mode = #tpu.pipeline_mode<synchronous>, transform_indices = @transform_1, window_bounds = array<i64: 896, 512>}, {pipeline_mode = #tpu.pipeline_mode<synchronous>, transform_indices = @transform_2, window_bounds = array<i64: 1, 512>}, {pipeline_mode = #tpu.pipeline_mode<synchronous>, transform_indices = @transform_3, window_bounds = array<i64: 512, 512>}, {pipeline_mode = #tpu.pipeline_mode<synchronous>, transform_indices = @transform_4, window_bounds = array<i64: 1, 512>}, {pipeline_mode = #tpu.pipeline_mode<synchronous>, transform_indices = @transform_5, window_bounds = array<i64: 512, 128>}, {pipeline_mode = #tpu.pipeline_mode<synchronous>, transform_indices = @transform_6, window_bounds = array<i64: 1, 128>}, {transform_indices = @transform_7, window_bounds = array<i64: 8, 128>}]} {
    %c0 = arith.constant 0 : index
    %c0_0 = arith.constant 0 : index
    %0 = vector.load %arg1[%c0, %c0_0] : memref<8x896xbf16, #tpu.memory_space<vmem>>, vector<8x896xbf16>
    %c0_1 = arith.constant 0 : index
    %c0_2 = arith.constant 0 : index
    %1 = vector.load %arg2[%c0_1, %c0_2] : memref<896x512xbf16, #tpu.memory_space<vmem>>, vector<896x512xbf16>
    %cst = arith.constant dense<0.000000e+00> : vector<8x512xf32>
    %2 = tpu.matmul %0, %1, %cst {dimension_numbers = #tpu.dot_dimension_numbers<[1], [0], [0], [1], [0, 0, 1, 1], [], []>} : vector<8x896xbf16>, vector<896x512xbf16>, vector<8x512xf32> -> vector<8x512xf32>
    %c0_3 = arith.constant 0 : index
    %c0_4 = arith.constant 0 : index
    %3 = vector.load %arg3[%c0_3, %c0_4] : memref<1x512xf32, #tpu.memory_space<vmem>>, vector<1x512xf32>
    %4 = vector.broadcast %3 : vector<1x512xf32> to vector<8x512xf32>
    %5 = arith.addf %2, %4 : vector<8x512xf32>
    %cst_5 = arith.constant 0.000000e+00 : f32
    %6 = vector.broadcast %cst_5 : f32 to vector<8x512xf32>
    %7 = arith.maximumf %5, %6 : vector<8x512xf32>
    %8 = arith.truncf %7 : vector<8x512xf32> to vector<8x512xbf16>
    %c0_6 = arith.constant 0 : index
    %c0_7 = arith.constant 0 : index
    %9 = vector.load %arg4[%c0_6, %c0_7] : memref<512x512xbf16, #tpu.memory_space<vmem>>, vector<512x512xbf16>
    %cst_8 = arith.constant dense<0.000000e+00> : vector<8x512xf32>
    %10 = tpu.matmul %8, %9, %cst_8 {dimension_numbers = #tpu.dot_dimension_numbers<[1], [0], [0], [1], [0, 0, 1, 1], [], []>} : vector<8x512xbf16>, vector<512x512xbf16>, vector<8x512xf32> -> vector<8x512xf32>
    %c0_9 = arith.constant 0 : index
    %c0_10 = arith.constant 0 : index
    %11 = vector.load %arg5[%c0_9, %c0_10] : memref<1x512xf32, #tpu.memory_space<vmem>>, vector<1x512xf32>
    %12 = vector.broadcast %11 : vector<1x512xf32> to vector<8x512xf32>
    %13 = arith.addf %10, %12 : vector<8x512xf32>
    %cst_11 = arith.constant 0.000000e+00 : f32
    %14 = vector.broadcast %cst_11 : f32 to vector<8x512xf32>
    %15 = arith.maximumf %13, %14 : vector<8x512xf32>
    %16 = arith.truncf %15 : vector<8x512xf32> to vector<8x512xbf16>
    %c0_12 = arith.constant 0 : index
    %c0_13 = arith.constant 0 : index
    %17 = vector.load %arg6[%c0_12, %c0_13] : memref<512x128xbf16, #tpu.memory_space<vmem>>, vector<512x128xbf16>
    %cst_14 = arith.constant dense<0.000000e+00> : vector<8x128xf32>
    %18 = tpu.matmul %16, %17, %cst_14 {dimension_numbers = #tpu.dot_dimension_numbers<[1], [0], [0], [1], [0, 0, 1, 1], [], []>} : vector<8x512xbf16>, vector<512x128xbf16>, vector<8x128xf32> -> vector<8x128xf32>
    %c0_15 = arith.constant 0 : index
    %c0_16 = arith.constant 0 : index
    %19 = vector.load %arg7[%c0_15, %c0_16] : memref<1x128xf32, #tpu.memory_space<vmem>>, vector<1x128xf32>
    %20 = vector.broadcast %19 : vector<1x128xf32> to vector<8x128xf32>
    %21 = arith.addf %18, %20 : vector<8x128xf32>
    %c0_17 = arith.constant 0 : index
    %c0_18 = arith.constant 0 : index
    %22 = vector.load %arg8[%c0_17, %c0_18] : memref<8x128xf32, #tpu.memory_space<vmem>>, vector<8x128xf32>
    tpu.vector_store %arg8[%c0_17, %c0_18], %21 {strides = array<i32>} : memref<8x128xf32, #tpu.memory_space<vmem>>, vector<8x128xf32>,
    return
  }
  func.func @transform_0(%arg0: i32) -> (i32, i32) {
    %c0_i32 = arith.constant 0 : i32
    %c0_i32_0 = arith.constant 0 : i32
    return %arg0, %c0_i32 : i32, i32
  }
  func.func @transform_1(%arg0: i32) -> (i32, i32) {
    %c0_i32 = arith.constant 0 : i32
    %c0_i32_0 = arith.constant 0 : i32
    %c0_i32_1 = arith.constant 0 : i32
    return %c0_i32, %c0_i32_0 : i32, i32
  }
  func.func @transform_2(%arg0: i32) -> (i32, i32) {
    %c0_i32 = arith.constant 0 : i32
    %c0_i32_0 = arith.constant 0 : i32
    %c0_i32_1 = arith.constant 0 : i32
    return %c0_i32, %c0_i32_0 : i32, i32
  }
  func.func @transform_3(%arg0: i32) -> (i32, i32) {
    %c0_i32 = arith.constant 0 : i32
    %c0_i32_0 = arith.constant 0 : i32
    %c0_i32_1 = arith.constant 0 : i32
    return %c0_i32, %c0_i32_0 : i32, i32
  }
  func.func @transform_4(%arg0: i32) -> (i32, i32) {
    %c0_i32 = arith.constant 0 : i32
    %c0_i32_0 = arith.constant 0 : i32
    %c0_i32_1 = arith.constant 0 : i32
    return %c0_i32, %c0_i32_0 : i32, i32
  }
  func.func @transform_5(%arg0: i32) -> (i32, i32) {
    %c0_i32 = arith.constant 0 : i32
    %c0_i32_0 = arith.constant 0 : i32
    %c0_i32_1 = arith.constant 0 : i32
    return %c0_i32, %c0_i32_0 : i32, i32
  }
  func.func @transform_6(%arg0: i32) -> (i32, i32) {
    %c0_i32 = arith.constant 0 : i32
    %c0_i32_0 = arith.constant 0 : i32
    %c0_i32_1 = arith.constant 0 : i32
    return %c0_i32, %c0_i32_0 : i32, i32
  }
  func.func @transform_7(%arg0: i32) -> (i32, i32) {
    %c0_i32 = arith.constant 0 : i32
    %c0_i32_0 = arith.constant 0 : i32
    return %arg0, %c0_i32 : i32, i32
  }
}

</mosaic_0001>

<bundles_post_ra>
// kernel: tpu_custom_call.1
= control target key start
LH: loop header
LB: loop body
LE: loop exit
PB: predicated region body
PF: predicated region fallthrough
CT: control target
= control target key end

     0   :  { %12 = vsyncpa [#allocation3], 0  ;;  %s4474_s0 = inlined_call_operand.hbm [shape: bf16[8,896], index: 0, kind: input, shape index: {}]   ;;  %s4475_s1 = inlined_call_operand.hbm [shape: bf16[896,512], index: 1, kind: input, shape index: {}]   ;;  %s4476_s2 = inlined_call_operand.vmem [shape: f32[1,512], index: 2, kind: input, shape index: {}]   ;;  %s4477_s3 = inlined_call_operand.hbm [shape: bf16[512,512], index: 3, kind: input, shape index: {}]   ;;  %s4478_s4 = inlined_call_operand.vmem [shape: f32[1,512], index: 4, kind: input, shape index: {}]   ;;  %s4479_s5 = inlined_call_operand.hbm [shape: bf16[512,128], index: 5, kind: input, shape index: {}]   ;;  %s4480_s6 = inlined_call_operand.vmem [shape: f32[1,128], index: 6, kind: input, shape index: {}]   ;;  %s4481_s7 = inlined_call_operand.hbm [shape: f32[8,128], index: 7, kind: output, shape index: {}]  }
   0x1   :  { %13 = vsyncpa [#allocation6], 0 }
   0x2   :  { %14 = vsyncpa [#allocation9], 0 }
   0x3   :  { %15 = vsyncpa [#allocation4], 0  ;;  %s4306_s24 = smov [#allocation5]   ;;  %s4188_s28 = scalar_lea.hbm %s4475_s1, 28672 }
   0x4   :  { %s31_s25 = sshll.u32 %s4306_s24, 4  ;;  %p4189_p0 = scmp.ne.s32.totalorder %s4475_s1, %s4188_s28  ;;  %s32_s25 = int_to_ptr.vmem [resolvable:$true] %s31_s25 }
   0x5   :  { %p4192_p1 = scmp.lt.u32.totalorder %s4188_s28, %s4475_s1 }
   0x7   :  { %p4194_p2 = pnand %p4192_p1, %p4189_p0 }
   0x9   :  { %4197 = shalt.err (!%p4194_p2)
}
   0xa   :  { %s4198_s10 = scalar_lea.vmem %s32_s25, 28672  ;;  %p4203_p4 = scmp.lt.s32.totalorder %s32_s25, %s32_s25 }
   0xb   :  { %p4199_p3 = scmp.ne.s32.totalorder %s32_s25, %s4198_s10  ;;  %p4204_p5 = scmp.lt.s32.totalorder %s4198_s10, %s4198_s10 }
   0xd   :  { %p4205_p6 = por %p4204_p5, %p4203_p4 }
   0xf   :  { %p4206_p7 = pnand %p4205_p6, %p4199_p3 }
  0x11   :  { %4209 = shalt.err (!%p4206_p7)
}
  0x12   :  { %s4307_s11 = smov 256   ;;  %s4308_s12 = smov 16  }
  0x13   :  { %37 = dma.hbm_to_vmem [thread:$0]  %s4475_s1, 28672, %s32_s25, [#allocation6], %s4307_s11, %s4307_s11, %s4308_s12  }
  0x14   :  { %s4309_s15 = smov [#allocation2]   ;;  %s4310_s17 = smov [#allocation7]  }
  0x15   :  { %s22_s16 = sshll.u32 %s4309_s15, 4  ;;  %s45_s18 = sshll.u32 %s4310_s17, 4  ;;  %s23_s16 = int_to_ptr.vmem [resolvable:$true] %s22_s16  ;;  %s46_s18 = int_to_ptr.vmem [resolvable:$true] %s45_s18 }
  0x16   :  { %s4210_s21 = scalar_lea.hbm %s4474_s0, 448 }
  0x17   :  { %p4211_p8 = scmp.ne.s32.totalorder %s4474_s0, %s4210_s21  ;;  %p4214_p9 = scmp.lt.u32.totalorder %s4210_s21, %s4474_s0 }
  0x19   :  { %p4216_p10 = pnand %p4214_p9, %p4211_p8 }
  0x1b   :  { %4219 = shalt.err (!%p4216_p10)
}
  0x1c   :  { %s4220_s1 = scalar_lea.vmem %s23_s16, 448  ;;  %p4225_p12 = scmp.lt.s32.totalorder %s23_s16, %s23_s16 }
  0x1d   :  { %p4221_p11 = scmp.ne.s32.totalorder %s23_s16, %s4220_s1  ;;  %p4226_p13 = scmp.lt.s32.totalorder %s4220_s1, %s4220_s1 }
  0x1f   :  { %p4227_p0 = por %p4226_p13, %p4225_p12 }
  0x21   :  { %p4228_p1 = pnand %p4227_p0, %p4221_p11 }
  0x23   :  { %4231 = shalt.err (!%p4228_p1)
}
  0x24   :  { %25 = dma.hbm_to_vmem [thread:$0]  %s4474_s0, 448, %s23_s16, [#allocation3]  }
  0x25   :  { %s4232_s30 = scalar_lea.hbm %s4477_s3, 16384 }
  0x26   :  { %p4233_p2 = scmp.ne.s32.totalorder %s4477_s3, %s4232_s30  ;;  %p4236_p3 = scmp.lt.u32.totalorder %s4232_s30, %s4477_s3 }
  0x28   :  { %p4238_p4 = pnand %p4236_p3, %p4233_p2 }
  0x2a   :  { %4241 = shalt.err (!%p4238_p4)
}
  0x2b   :  { %s4242_s14 = scalar_lea.vmem %s46_s18, 16384  ;;  %p4247_p6 = scmp.lt.s32.totalorder %s46_s18, %s46_s18 }
  0x2c   :  { %p4243_p5 = scmp.ne.s32.totalorder %s46_s18, %s4242_s14  ;;  %p4248_p7 = scmp.lt.s32.totalorder %s4242_s14, %s4242_s14 }
  0x2e   :  { %p4249_p8 = por %p4248_p7, %p4247_p6 }
  0x30   :  { %p4250_p9 = pnand %p4249_p8, %p4243_p5 }
  0x32   :  { %4253 = shalt.err (!%p4250_p9)
}
  0x33   :  { %51 = dma.hbm_to_vmem [thread:$0]  %s4477_s3, 16384, %s46_s18, [#allocation6], %s4307_s11, %s4307_s11, %s4308_s12  }
  0x34   :  { %s4311_s16 = smov [#allocation8]   ;;  %s4254_s21 = scalar_lea.hbm %s4479_s5, 4096 }
  0x35   :  { %s59_s17 = sshll.u32 %s4311_s16, 4  ;;  %p4255_p10 = scmp.ne.s32.totalorder %s4479_s5, %s4254_s21  ;;  %s60_s17 = int_to_ptr.vmem [resolvable:$true] %s59_s17 }
  0x36   :  { %p4258_p11 = scmp.lt.u32.totalorder %s4254_s21, %s4479_s5 }
  0x38   :  { %p4260_p12 = pnand %p4258_p11, %p4255_p10 }
  0x3a   :  { %4263 = shalt.err (!%p4260_p12)
}
  0x3b   :  { %s4264_s1 = scalar_lea.vmem %s60_s17, 4096  ;;  %p4269_p0 = scmp.lt.s32.totalorder %s60_s17, %s60_s17 }
  0x3c   :  { %p4265_p13 = scmp.ne.s32.totalorder %s60_s17, %s4264_s1  ;;  %p4270_p1 = scmp.lt.s32.totalorder %s4264_s1, %s4264_s1 }
  0x3e   :  { %p4271_p2 = por %p4270_p1, %p4269_p0 }
  0x40   :  { %p4272_p3 = pnand %p4271_p2, %p4265_p13 }
  0x42   :  { %4275 = shalt.err (!%p4272_p3)
}
  0x43   :  { %s4312_s3 = smov 64   ;;  %s4313_s11 = smov 4  }
  0x44   :  { %65 = dma.hbm_to_vmem [thread:$0]  %s4479_s5, 4096, %s60_s17, [#allocation9], %s4312_s3, %s4312_s3, %s4313_s11  }
  0x45   :  { %4298 = dma.done.wait [#allocation3], 448  }
  0x46   :  { %4299 = vsyncadd [#allocation3], 4294966848 }
  0x47   :  { %4300 = dma.done.wait [#allocation6], 45056  }
  0x48   :  { %4301 = vsyncadd [#allocation6], 4294922240 }
  0x49   :  { %4302 = dma.done.wait [#allocation9], 4096  }
  0x4a   :  { %4303 = vsyncadd [#allocation9], 4294963200  ;;  %v3621_v0 = vld [vmem:[#allocation5 + $0x4] ss:$16 sps:$4 sm:$0xff]   ;;  %v3623_v1 = vld [vmem:[#allocation5 + $0xc] ss:$16 sps:$4 sm:$0xff]  }
  0x4b   :  { %1476 = vmatprep.subr.bf16.mxu0 %v3621_v0  ;;  %v3625_v2 = vld [vmem:[#allocation5] ss:$16 sps:$4 sm:$0xff]   ;;  %v3626_v3 = vld [vmem:[#allocation5 + $0x8] ss:$16 sps:$4 sm:$0xff]   ;;  %1640 = vmatprep.subr.bf16.mxu1 %v3623_v1  ;;  %v3627_v4 = vld [vmem:[#allocation5 + $0x24] ss:$16 sps:$4 sm:$0xff]  }
  0x4c   :  { %1477 = vmatpush1.bf16.msra.mxu0 %v3625_v2  ;;  %1641 = vmatpush1.bf16.msra.mxu1 %v3626_v3  ;;  %v3629_v5 = vld [vmem:[#allocation5 + $0x2c] ss:$16 sps:$4 sm:$0xff]   ;;  %v3631_v6 = vld [vmem:[#allocation5 + $0x20] ss:$16 sps:$4 sm:$0xff]   ;;  %v3632_v7 = vld [vmem:[#allocation5 + $0x28] ss:$16 sps:$4 sm:$0xff]  }
  0x4d   :  { %1478 = vmatprep.subr.bf16.mxu0 %v3627_v4  ;;  %1642 = vmatprep.subr.bf16.mxu1 %v3629_v5  ;;  %v3633_v8 = vld [vmem:[#allocation5 + $0x44] ss:$16 sps:$4 sm:$0xff]   ;;  %v3635_v9 = vld [vmem:[#allocation5 + $0x4c] ss:$16 sps:$4 sm:$0xff]   ;;  %v3637_v10 = vld [vmem:[#allocation5 + $0x40] ss:$16 sps:$4 sm:$0xff]  }
  0x4e   :  { %v3638_v11 = vld [vmem:[#allocation5 + $0x48] ss:$16 sps:$4 sm:$0xff]   ;;  %v3639_v12 = vld [vmem:[#allocation5 + $0x64] ss:$16 sps:$4 sm:$0xff]   ;;  %v3641_v13 = vld [vmem:[#allocation5 + $0x6c] ss:$16 sps:$4 sm:$0xff]  }
  0x4f   :  { %v3643_v14 = vld [vmem:[#allocation5 + $0x60] ss:$16 sps:$4 sm:$0xff]   ;;  %v3644_v15 = vld [vmem:[#allocation5 + $0x68] ss:$16 sps:$4 sm:$0xff]   ;;  %v3645_v16 = vld [vmem:[#allocation5 + $0x84] ss:$16 sps:$4 sm:$0xff]  }
  0x50   :  { %1479 = vmatpush1.bf16.msra.mxu0 %v3631_v6  ;;  %1643 = vmatpush1.bf16.msra.mxu1 %v3632_v7  ;;  %v3647_v17 = vld [vmem:[#allocation5 + $0x8c] ss:$16 sps:$4 sm:$0xff]   ;;  %v3649_v18 = vld [vmem:[#allocation5 + $0x80] ss:$16 sps:$4 sm:$0xff]   ;;  %v3650_v19 = vld [vmem:[#allocation5 + $0x88] ss:$16 sps:$4 sm:$0xff]  }
  0x51   :  { %1480 = vmatprep.subr.bf16.mxu0 %v3633_v8  ;;  %1644 = vmatprep.subr.bf16.mxu1 %v3635_v9  ;;  %v3651_v20 = vld [vmem:[#allocation5 + $0xa4] ss:$16 sps:$4 sm:$0xff]   ;;  %v3653_v21 = vld [vmem:[#allocation5 + $0xac] ss:$16 sps:$4 sm:$0xff]   ;;  %v3655_v22 = vld [vmem:[#allocation5 + $0xa0] ss:$16 sps:$4 sm:$0xff]  }
  0x52   :  { %v3656_v23 = vld [vmem:[#allocation5 + $0xa8] ss:$16 sps:$4 sm:$0xff]   ;;  %v3657_v24 = vld [vmem:[#allocation5 + $0xc4] ss:$16 sps:$4 sm:$0xff]   ;;  %v3659_v25 = vld [vmem:[#allocation5 + $0xcc] ss:$16 sps:$4 sm:$0xff]  }
  0x53   :  { %v3661_v26 = vld [vmem:[#allocation5 + $0xc0] ss:$16 sps:$4 sm:$0xff]   ;;  %v3662_v27 = vld [vmem:[#allocation5 + $0xc8] ss:$16 sps:$4 sm:$0xff]   ;;  %v3663_v28 = vld [vmem:[#allocation5 + $0xe4] ss:$16 sps:$4 sm:$0xff]  }
  0x54   :  { %1481 = vmatpush1.bf16.msra.mxu0 %v3637_v10  ;;  %1645 = vmatpush1.bf16.msra.mxu1 %v3638_v11  ;;  %v3665_v29 = vld [vmem:[#allocation5 + $0xec] ss:$16 sps:$4 sm:$0xff]   ;;  %v3667_v30 = vld [vmem:[#allocation5 + $0xe0] ss:$16 sps:$4 sm:$0xff]   ;;  %v3668_v31 = vld [vmem:[#allocation5 + $0xe8] ss:$16 sps:$4 sm:$0xff]  }
  0x55   :  { %1482 = vmatprep.subr.bf16.mxu0 %v3639_v12  ;;  %1646 = vmatprep.subr.bf16.mxu1 %v3641_v13  ;;  %v3669_v32 = vld [vmem:[#allocation5 + $0x104] ss:$16 sps:$4 sm:$0xff]   ;;  %v3671_v33 = vld [vmem:[#allocation5 + $0x10c] ss:$16 sps:$4 sm:$0xff]   ;;  %v3673_v34 = vld [vmem:[#allocation5 + $0x100] ss:$16 sps:$4 sm:$0xff]  }
  0x56   :  { %v3674_v35 = vld [vmem:[#allocation5 + $0x108] ss:$16 sps:$4 sm:$0xff]   ;;  %v3675_v36 = vld [vmem:[#allocation5 + $0x124] ss:$16 sps:$4 sm:$0xff]   ;;  %v3677_v37 = vld [vmem:[#allocation5 + $0x12c] ss:$16 sps:$4 sm:$0xff]  }
  0x57   :  { %v3679_v38 = vld [vmem:[#allocation5 + $0x120] ss:$16 sps:$4 sm:$0xff]   ;;  %v3680_v39 = vld [vmem:[#allocation5 + $0x128] ss:$16 sps:$4 sm:$0xff]   ;;  %v3681_v40 = vld [vmem:[#allocation5 + $0x144] ss:$16 sps:$4 sm:$0xff]  }
  0x58   :  { %1483 = vmatpush1.bf16.msra.mxu0 %v3643_v14  ;;  %1647 = vmatpush1.bf16.msra.mxu1 %v3644_v15  ;;  %v3683_v41 = vld [vmem:[#allocation5 + $0x14c] ss:$16 sps:$4 sm:$0xff]   ;;  %v3685_v42 = vld [vmem:[#allocation5 + $0x140] ss:$16 sps:$4 sm:$0xff]   ;;  %v3686_v43 = vld [vmem:[#allocation5 + $0x148] ss:$16 sps:$4 sm:$0xff]  }
  0x59   :  { %1484 = vmatprep.subr.bf16.mxu0 %v3645_v16  ;;  %1648 = vmatprep.subr.bf16.mxu1 %v3647_v17  ;;  %v3687_v44 = vld [vmem:[#allocation5 + $0x164] ss:$16 sps:$4 sm:$0xff]   ;;  %v3689_v45 = vld [vmem:[#allocation5 + $0x16c] ss:$16 sps:$4 sm:$0xff]   ;;  %v3691_v47 = vld [vmem:[#allocation5 + $0x160] ss:$16 sps:$4 sm:$0xff]  }
  0x5a   :  { %v81_v46 = vld [vmem:[#allocation2] sm:$0xff]  ;;  %v3695_v51 = vld [vmem:[#allocation5 + $0x18c] ss:$16 sps:$4 sm:$0xff]   ;;  %v3697_v52 = vld [vmem:[#allocation5 + $0x180] ss:$16 sps:$4 sm:$0xff]   ;;  %s4315_s29 = smov [#allocation10]  }
  0x5b   :  { %v3136_v48 = vcombine.high %v81_v46, %v81_v46  ;;  %v3692_v49 = vld [vmem:[#allocation5 + $0x168] ss:$16 sps:$4 sm:$0xff]   ;;  %v3693_v50 = vld [vmem:[#allocation5 + $0x184] ss:$16 sps:$4 sm:$0xff]   ;;  %v3701_v55 = vld [vmem:[#allocation5 + $0x1ac] ss:$16 sps:$4 sm:$0xff]   ;;  %v3135_v4 = vcombine.low %v81_v46, %v81_v46 }
  0x5c   :  { %1485 = vmatpush1.bf16.msra.mxu0 %v3649_v18  ;;  %1649 = vmatpush1.bf16.msra.mxu1 %v3650_v19  ;;  %v3698_v53 = vld [vmem:[#allocation5 + $0x188] ss:$16 sps:$4 sm:$0xff]   ;;  %v3699_v54 = vld [vmem:[#allocation5 + $0x1a4] ss:$16 sps:$4 sm:$0xff]   ;;  %v3703_v56 = vld [vmem:[#allocation5 + $0x1a0] ss:$16 sps:$4 sm:$0xff]  }
  0x5d   :  { %1486 = vmatprep.subr.bf16.mxu0 %v3651_v20  ;;  %1650 = vmatprep.subr.bf16.mxu1 %v3653_v21  ;;  %v3704_v57 = vld [vmem:[#allocation5 + $0x1a8] ss:$16 sps:$4 sm:$0xff]   ;;  %v3705_v58 = vld [vmem:[#allocation5 + $0x1c4] ss:$16 sps:$4 sm:$0xff]   ;;  %v3707_v59 = vld [vmem:[#allocation5 + $0x1cc] ss:$16 sps:$4 sm:$0xff]  }
  0x5e   :  { %1508 = vmatprep.mubr.bf16.mxu0 %v3136_v48  ;;  %1672 = vmatprep.mubr.bf16.mxu1 %v3136_v48  ;;  %v3709_v60 = vld [vmem:[#allocation5 + $0x1c0] ss:$16 sps:$4 sm:$0xff]   ;;  %v3710_v61 = vld [vmem:[#allocation5 + $0x1c8] ss:$16 sps:$4 sm:$0xff]   ;;  %v3711_v62 = vld [vmem:[#allocation5 + $0x1e4] ss:$16 sps:$4 sm:$0xff]  }
  0x5f   :  { %v3713_v63 = vld [vmem:[#allocation5 + $0x1ec] ss:$16 sps:$4 sm:$0xff]   ;;  %v3715_v0 = vld [vmem:[#allocation5 + $0x1e0] ss:$16 sps:$4 sm:$0xff]   ;;  %v3716_v1 = vld [vmem:[#allocation5 + $0x1e8] ss:$16 sps:$4 sm:$0xff]  }
  0x60   :  { %1487 = vmatpush1.bf16.msra.mxu0 %v3655_v22  ;;  %1651 = vmatpush1.bf16.msra.mxu1 %v3656_v23  ;;  %v3721_v2 = vld [vmem:[#allocation5 + $0x204] ss:$16 sps:$4 sm:$0xff]   ;;  %v3724_v3 = vld [vmem:[#allocation5 + $0x20c] ss:$16 sps:$4 sm:$0xff]   ;;  %v3719_v5 = vld [vmem:[#allocation5 + $0x200] ss:$16 sps:$4 sm:$0xff]  }
  0x61   :  { %1488 = vmatprep.subr.bf16.mxu0 %v3657_v24  ;;  %1652 = vmatprep.subr.bf16.mxu1 %v3659_v25  ;;  %v3722_v6 = vld [vmem:[#allocation5 + $0x208] ss:$16 sps:$4 sm:$0xff]   ;;  %v3727_v7 = vld [vmem:[#allocation5 + $0x224] ss:$16 sps:$4 sm:$0xff]   ;;  %v3730_v8 = vld [vmem:[#allocation5 + $0x22c] ss:$16 sps:$4 sm:$0xff]  }
  0x62   :  { %v3725_v9 = vld [vmem:[#allocation5 + $0x220] ss:$16 sps:$4 sm:$0xff]   ;;  %v3728_v10 = vld [vmem:[#allocation5 + $0x228] ss:$16 sps:$4 sm:$0xff]   ;;  %v3733_v11 = vld [vmem:[#allocation5 + $0x244] ss:$16 sps:$4 sm:$0xff]  }
  0x63   :  { %v3736_v12 = vld [vmem:[#allocation5 + $0x24c] ss:$16 sps:$4 sm:$0xff]   ;;  %v3731_v13 = vld [vmem:[#allocation5 + $0x240] ss:$16 sps:$4 sm:$0xff]   ;;  %v3734_v14 = vld [vmem:[#allocation5 + $0x248] ss:$16 sps:$4 sm:$0xff]  }
  0x64   :  { %1489 = vmatpush1.bf16.msra.mxu0 %v3661_v26  ;;  %1653 = vmatpush1.bf16.msra.mxu1 %v3662_v27  ;;  %v3739_v15 = vld [vmem:[#allocation5 + $0x264] ss:$16 sps:$4 sm:$0xff]   ;;  %v3742_v16 = vld [vmem:[#allocation5 + $0x26c] ss:$16 sps:$4 sm:$0xff]   ;;  %v3737_v17 = vld [vmem:[#allocation5 + $0x260] ss:$16 sps:$4 sm:$0xff]  }
  0x65   :  { %1490 = vmatprep.subr.bf16.mxu0 %v3663_v28  ;;  %1654 = vmatprep.subr.bf16.mxu1 %v3665_v29  ;;  %v3740_v18 = vld [vmem:[#allocation5 + $0x268] ss:$16 sps:$4 sm:$0xff]   ;;  %v3745_v19 = vld [vmem:[#allocation5 + $0x284] ss:$16 sps:$4 sm:$0xff]   ;;  %v3748_v20 = vld [vmem:[#allocation5 + $0x28c] ss:$16 sps:$4 sm:$0xff]  }
  0x66   :  { %v3743_v21 = vld [vmem:[#allocation5 + $0x280] ss:$16 sps:$4 sm:$0xff]   ;;  %v3746_v22 = vld [vmem:[#allocation5 + $0x288] ss:$16 sps:$4 sm:$0xff]   ;;  %v3751_v23 = vld [vmem:[#allocation5 + $0x2a4] ss:$16 sps:$4 sm:$0xff]  }
  0x67   :  { %v3754_v24 = vld [vmem:[#allocation5 + $0x2ac] ss:$16 sps:$4 sm:$0xff]   ;;  %v3749_v25 = vld [vmem:[#allocation5 + $0x2a0] ss:$16 sps:$4 sm:$0xff]   ;;  %v3752_v26 = vld [vmem:[#allocation5 + $0x2a8] ss:$16 sps:$4 sm:$0xff]  }
  0x68   :  { %1491 = vmatpush1.bf16.msra.mxu0 %v3667_v30  ;;  %1655 = vmatpush1.bf16.msra.mxu1 %v3668_v31  ;;  %v3757_v27 = vld [vmem:[#allocation5 + $0x2c4] ss:$16 sps:$4 sm:$0xff]   ;;  %v3760_v28 = vld [vmem:[#allocation5 + $0x2cc] ss:$16 sps:$4 sm:$0xff]   ;;  %v3755_v31 = vld [vmem:[#allocation5 + $0x2c0] ss:$16 sps:$4 sm:$0xff]  }
  0x69   :  { %1492 = vmatprep.subr.bf16.mxu0 %v3669_v32  ;;  %1656 = vmatprep.subr.bf16.mxu1 %v3671_v33  ;;  %v4410_v29 = vld [vmem:[#allocation2 + $0x8] sm:$0xff]  ;;  %v3758_v32 = vld [vmem:[#allocation5 + $0x2c8] ss:$16 sps:$4 sm:$0xff]   ;;  %v3763_v33 = vld [vmem:[#allocation5 + $0x2e4] ss:$16 sps:$4 sm:$0xff]   ;;  %s3124_s30 = sshll.u32 %s4315_s29, 4  ;;  %s3125_s30 = int_to_ptr.vmem [resolvable:$true] %s3124_s30 }
  0x6a   :  { %v3138_v30 = vcombine.high %v4410_v29, %v4410_v29  ;;  %v3784_v46 = vld [vmem:[#allocation5 + $0x34c] ss:$16 sps:$4 sm:$0xff]   ;;  %v3782_v48 = vld [vmem:[#allocation5 + $0x348] ss:$16 sps:$4 sm:$0xff]   ;;  %s4276_s8 = scalar_lea.vmem %s3125_s30, 128  ;;  %p4281_p5 = scmp.lt.s32.totalorder %s3125_s30, %s3125_s30 }
  0x6b   :  { %p4277_p4 = scmp.ne.s32.totalorder %s3125_s30, %s4276_s8  ;;  %p4282_p6 = scmp.lt.s32.totalorder %s4276_s8, %s4276_s8 }
  0x6c   :  { %1493 = vmatpush1.bf16.msra.mxu0 %v3673_v34  ;;  %1657 = vmatpush1.bf16.msra.mxu1 %v3674_v35  ;;  %v3766_v34 = vld [vmem:[#allocation5 + $0x2ec] ss:$16 sps:$4 sm:$0xff]   ;;  %v3761_v35 = vld [vmem:[#allocation5 + $0x2e0] ss:$16 sps:$4 sm:$0xff]  }
  0x6d   :  { %1494 = vmatprep.subr.bf16.mxu0 %v3675_v36  ;;  %1658 = vmatprep.subr.bf16.mxu1 %v3677_v37  ;;  %v3764_v36 = vld [vmem:[#allocation5 + $0x2e8] ss:$16 sps:$4 sm:$0xff]   ;;  %v3769_v37 = vld [vmem:[#allocation5 + $0x304] ss:$16 sps:$4 sm:$0xff]   ;;  %p4283_p7 = por %p4282_p6, %p4281_p5 }
  0x6f   :  { %p4284_p8 = pnand %p4283_p7, %p4277_p4 }
  0x70   :  { %1495 = vmatpush1.bf16.msra.mxu0 %v3679_v38  ;;  %1659 = vmatpush1.bf16.msra.mxu1 %v3680_v39  ;;  %v3772_v38 = vld [vmem:[#allocation5 + $0x30c] ss:$16 sps:$4 sm:$0xff]   ;;  %v3767_v39 = vld [vmem:[#allocation5 + $0x300] ss:$16 sps:$4 sm:$0xff]  }
  0x71   :  { %1496 = vmatprep.subr.bf16.mxu0 %v3681_v40  ;;  %1660 = vmatprep.subr.bf16.mxu1 %v3683_v41  ;;  %v3770_v40 = vld [vmem:[#allocation5 + $0x308] ss:$16 sps:$4 sm:$0xff]   ;;  %v3775_v41 = vld [vmem:[#allocation5 + $0x324] ss:$16 sps:$4 sm:$0xff]  }
  0x74   :  { %1497 = vmatpush1.bf16.msra.mxu0 %v3685_v42  ;;  %1661 = vmatpush1.bf16.msra.mxu1 %v3686_v43  ;;  %v3778_v42 = vld [vmem:[#allocation5 + $0x32c] ss:$16 sps:$4 sm:$0xff]   ;;  %v3773_v43 = vld [vmem:[#allocation5 + $0x320] ss:$16 sps:$4 sm:$0xff]  }
  0x75   :  { %1498 = vmatprep.subr.bf16.mxu0 %v3687_v44  ;;  %1662 = vmatprep.subr.bf16.mxu1 %v3689_v45  ;;  %v3776_v44 = vld [vmem:[#allocation5 + $0x328] ss:$16 sps:$4 sm:$0xff]   ;;  %v3781_v45 = vld [vmem:[#allocation5 + $0x344] ss:$16 sps:$4 sm:$0xff]  }
  0x78   :  { %1499 = vmatpush1.bf16.msra.mxu0 %v3691_v47  ;;  %1663 = vmatpush1.bf16.msra.mxu1 %v3692_v49  ;;  %v3779_v47 = vld [vmem:[#allocation5 + $0x340] ss:$16 sps:$4 sm:$0xff]   ;;  %v3787_v49 = vld [vmem:[#allocation5 + $0x364] ss:$16 sps:$4 sm:$0xff]  }
  0x79   :  { %1500 = vmatprep.subr.bf16.mxu0 %v3693_v50  ;;  %1664 = vmatprep.subr.bf16.mxu1 %v3695_v51  ;;  %v3790_v50 = vld [vmem:[#allocation5 + $0x36c] ss:$16 sps:$4 sm:$0xff]   ;;  %v3785_v51 = vld [vmem:[#allocation5 + $0x360] ss:$16 sps:$4 sm:$0xff]  }
  0x7c   :  { %1501 = vmatpush1.bf16.msra.mxu0 %v3697_v52  ;;  %1665 = vmatpush1.bf16.msra.mxu1 %v3698_v53  ;;  %v3788_v52 = vld [vmem:[#allocation5 + $0x368] ss:$16 sps:$4 sm:$0xff]   ;;  %v3793_v53 = vld [vmem:[#allocation5 + $0x384] ss:$16 sps:$4 sm:$0xff]  }
  0x7d   :  { %1502 = vmatprep.subr.bf16.mxu0 %v3699_v54  ;;  %1666 = vmatprep.subr.bf16.mxu1 %v3701_v55  ;;  %v3796_v54 = vld [vmem:[#allocation5 + $0x38c] ss:$16 sps:$4 sm:$0xff]   ;;  %v3791_v55 = vld [vmem:[#allocation5 + $0x380] ss:$16 sps:$4 sm:$0xff]  }
  0x80   :  { %1503 = vmatpush1.bf16.msra.mxu0 %v3703_v56  ;;  %1667 = vmatpush1.bf16.msra.mxu1 %v3704_v57  ;;  %v3794_v56 = vld [vmem:[#allocation5 + $0x388] ss:$16 sps:$4 sm:$0xff]   ;;  %v3799_v57 = vld [vmem:[#allocation5 + $0x3a4] ss:$16 sps:$4 sm:$0xff]  }
  0x81   :  { %1504 = vmatprep.subr.bf16.mxu0 %v3705_v58  ;;  %1668 = vmatprep.subr.bf16.mxu1 %v3707_v59  ;;  %v3802_v58 = vld [vmem:[#allocation5 + $0x3ac] ss:$16 sps:$4 sm:$0xff]   ;;  %v3797_v59 = vld [vmem:[#allocation5 + $0x3a0] ss:$16 sps:$4 sm:$0xff]  }
  0x84   :  { %1505 = vmatpush1.bf16.msra.mxu0 %v3709_v60  ;;  %1669 = vmatpush1.bf16.msra.mxu1 %v3710_v61  ;;  %v3800_v60 = vld [vmem:[#allocation5 + $0x3a8] ss:$16 sps:$4 sm:$0xff]   ;;  %v3805_v61 = vld [vmem:[#allocation5 + $0x3c4] ss:$16 sps:$4 sm:$0xff]  }
  0x85   :  { %1506 = vmatprep.subr.bf16.mxu0 %v3711_v62  ;;  %1670 = vmatprep.subr.bf16.mxu1 %v3713_v63  ;;  %v3808_v62 = vld [vmem:[#allocation5 + $0x3cc] ss:$16 sps:$4 sm:$0xff]   ;;  %v3803_v63 = vld [vmem:[#allocation5 + $0x3c0] ss:$16 sps:$4 sm:$0xff]  }
  0x88   :  { %1507 = vmatpush1.bf16.msra.mxu0 %v3715_v0  ;;  %1671 = vmatpush1.bf16.msra.mxu1 %v3716_v1  ;;  %v3806_v0 = vld [vmem:[#allocation5 + $0x3c8] ss:$16 sps:$4 sm:$0xff]   ;;  %v3811_v1 = vld [vmem:[#allocation5 + $0x3e4] ss:$16 sps:$4 sm:$0xff]  }
  0x89   :  { %1517 = vmatprep.subr.bf16.mxu0 %v3721_v2  ;;  %1681 = vmatprep.subr.bf16.mxu1 %v3724_v3  ;;  %v3814_v2 = vld [vmem:[#allocation5 + $0x3ec] ss:$16 sps:$4 sm:$0xff]   ;;  %v3809_v3 = vld [vmem:[#allocation5 + $0x3e0] ss:$16 sps:$4 sm:$0xff]  }
  0x8b   :  { %1509 = vmatmul.mubr.bf16.vlgmr.msra.gmra.mrb[0].mxu0 %v3135_v4  ;;  %1673 = vmatmul.mubr.bf16.vlgmr.msra.gmra.mrb[0].mxu1 %v3135_v4  ;;  %v3812_v4 = vld [vmem:[#allocation5 + $0x3e8] ss:$16 sps:$4 sm:$0xff]  }
  0x8c   :  { %1518 = vmatpush1.bf16.msra.mxu0 %v3719_v5  ;;  %1682 = vmatpush1.bf16.msra.mxu1 %v3722_v6  ;;  %v3819_v5 = vld [vmem:[#allocation5 + $0x404] ss:$16 sps:$4 sm:$0xff]   ;;  %v3822_v6 = vld [vmem:[#allocation5 + $0x40c] ss:$16 sps:$4 sm:$0xff]  }
  0x8d   :  { %1519 = vmatprep.subr.bf16.mxu0 %v3727_v7  ;;  %1683 = vmatprep.subr.bf16.mxu1 %v3730_v8  ;;  %v3137_v7 = vcombine.low %v4410_v29, %v4410_v29  ;;  %v3817_v8 = vld [vmem:[#allocation5 + $0x400] ss:$16 sps:$4 sm:$0xff]   ;;  %v3852_v29 = vld [vmem:[#allocation5 + $0x4ac] ss:$16 sps:$4 sm:$0xff]  }
  0x8e   :  { %1549 = vmatprep.mubr.bf16.mxu0 %v3138_v30  ;;  %1713 = vmatprep.mubr.bf16.mxu1 %v3138_v30  ;;  %v3847_v30 = vld [vmem:[#allocation5 + $0x4a0] ss:$16 sps:$4 sm:$0xff]  }
  0x90   :  { %1520 = vmatpush1.bf16.msra.mxu0 %v3725_v9  ;;  %1684 = vmatpush1.bf16.msra.mxu1 %v3728_v10  ;;  %v3820_v9 = vld [vmem:[#allocation5 + $0x408] ss:$16 sps:$4 sm:$0xff]   ;;  %v3825_v10 = vld [vmem:[#allocation5 + $0x424] ss:$16 sps:$4 sm:$0xff]  }
  0x91   :  { %1521 = vmatprep.subr.bf16.mxu0 %v3733_v11  ;;  %1685 = vmatprep.subr.bf16.mxu1 %v3736_v12  ;;  %v4416_v11 = vld [vmem:[#allocation2 + $0x10] sm:$0xff]  ;;  %v3828_v12 = vld [vmem:[#allocation5 + $0x42c] ss:$16 sps:$4 sm:$0xff]  }
  0x94   :  { %1522 = vmatpush1.bf16.msra.mxu0 %v3731_v13  ;;  %1686 = vmatpush1.bf16.msra.mxu1 %v3734_v14  ;;  %v3140_v13 = vcombine.high %v4416_v11, %v4416_v11  ;;  %v3823_v14 = vld [vmem:[#allocation5 + $0x420] ss:$16 sps:$4 sm:$0xff]  }
  0x95   :  { %1523 = vmatprep.subr.bf16.mxu0 %v3739_v15  ;;  %1687 = vmatprep.subr.bf16.mxu1 %v3742_v16  ;;  %v3826_v15 = vld [vmem:[#allocation5 + $0x428] ss:$16 sps:$4 sm:$0xff]   ;;  %v3831_v16 = vld [vmem:[#allocation5 + $0x444] ss:$16 sps:$4 sm:$0xff]  }
  0x98   :  { %1524 = vmatpush1.bf16.msra.mxu0 %v3737_v17  ;;  %1688 = vmatpush1.bf16.msra.mxu1 %v3740_v18  ;;  %v3834_v17 = vld [vmem:[#allocation5 + $0x44c] ss:$16 sps:$4 sm:$0xff]   ;;  %v3829_v18 = vld [vmem:[#allocation5 + $0x440] ss:$16 sps:$4 sm:$0xff]  }
  0x99   :  { %1525 = vmatprep.subr.bf16.mxu0 %v3745_v19  ;;  %1689 = vmatprep.subr.bf16.mxu1 %v3748_v20  ;;  %v3832_v19 = vld [vmem:[#allocation5 + $0x448] ss:$16 sps:$4 sm:$0xff]   ;;  %v3837_v20 = vld [vmem:[#allocation5 + $0x464] ss:$16 sps:$4 sm:$0xff]  }
  0x9c   :  { %1526 = vmatpush1.bf16.msra.mxu0 %v3743_v21  ;;  %1690 = vmatpush1.bf16.msra.mxu1 %v3746_v22  ;;  %v3840_v21 = vld [vmem:[#allocation5 + $0x46c] ss:$16 sps:$4 sm:$0xff]   ;;  %v3835_v22 = vld [vmem:[#allocation5 + $0x460] ss:$16 sps:$4 sm:$0xff]  }
  0x9d   :  { %1527 = vmatprep.subr.bf16.mxu0 %v3751_v23  ;;  %1691 = vmatprep.subr.bf16.mxu1 %v3754_v24  ;;  %v3838_v23 = vld [vmem:[#allocation5 + $0x468] ss:$16 sps:$4 sm:$0xff]   ;;  %v3843_v24 = vld [vmem:[#allocation5 + $0x484] ss:$16 sps:$4 sm:$0xff]  }
  0xa0   :  { %1528 = vmatpush1.bf16.msra.mxu0 %v3749_v25  ;;  %1692 = vmatpush1.bf16.msra.mxu1 %v3752_v26  ;;  %v3846_v25 = vld [vmem:[#allocation5 + $0x48c] ss:$16 sps:$4 sm:$0xff]   ;;  %v3841_v26 = vld [vmem:[#allocation5 + $0x480] ss:$16 sps:$4 sm:$0xff]  }
  0xa1   :  { %1529 = vmatprep.subr.bf16.mxu0 %v3757_v27  ;;  %1693 = vmatprep.subr.bf16.mxu1 %v3760_v28  ;;  %v3844_v27 = vld [vmem:[#allocation5 + $0x488] ss:$16 sps:$4 sm:$0xff]   ;;  %v3849_v28 = vld [vmem:[#allocation5 + $0x4a4] ss:$16 sps:$4 sm:$0xff]  }
  0xa4   :  { %1530 = vmatpush1.bf16.msra.mxu0 %v3755_v31  ;;  %1694 = vmatpush1.bf16.msra.mxu1 %v3758_v32  ;;  %v3850_v31 = vld [vmem:[#allocation5 + $0x4a8] ss:$16 sps:$4 sm:$0xff]   ;;  %v3855_v32 = vld [vmem:[#allocation5 + $0x4c4] ss:$16 sps:$4 sm:$0xff]  }
  0xa5   :  { %1531 = vmatprep.subr.bf16.mxu0 %v3763_v33  ;;  %1695 = vmatprep.subr.bf16.mxu1 %v3766_v34  ;;  %v3858_v33 = vld [vmem:[#allocation5 + $0x4cc] ss:$16 sps:$4 sm:$0xff]   ;;  %v3853_v34 = vld [vmem:[#allocation5 + $0x4c0] ss:$16 sps:$4 sm:$0xff]  }
  0xa8   :  { %1532 = vmatpush1.bf16.msra.mxu0 %v3761_v35  ;;  %1696 = vmatpush1.bf16.msra.mxu1 %v3764_v36  ;;  %v3856_v35 = vld [vmem:[#allocation5 + $0x4c8] ss:$16 sps:$4 sm:$0xff]   ;;  %v3861_v36 = vld [vmem:[#allocation5 + $0x4e4] ss:$16 sps:$4 sm:$0xff]  }
  0xa9   :  { %1533 = vmatprep.subr.bf16.mxu0 %v3769_v37  ;;  %1697 = vmatprep.subr.bf16.mxu1 %v3772_v38  ;;  %v3864_v37 = vld [vmem:[#allocation5 + $0x4ec] ss:$16 sps:$4 sm:$0xff]   ;;  %v3859_v38 = vld [vmem:[#allocation5 + $0x4e0] ss:$16 sps:$4 sm:$0xff]  }
  0xac   :  { %1534 = vmatpush1.bf16.msra.mxu0 %v3767_v39  ;;  %1698 = vmatpush1.bf16.msra.mxu1 %v3770_v40  ;;  %v3862_v39 = vld [vmem:[#allocation5 + $0x4e8] ss:$16 sps:$4 sm:$0xff]   ;;  %v3867_v40 = vld [vmem:[#allocation5 + $0x504] ss:$16 sps:$4 sm:$0xff]  }
  0xad   :  { %1535 = vmatprep.subr.bf16.mxu0 %v3775_v41  ;;  %1699 = vmatprep.subr.bf16.mxu1 %v3778_v42  ;;  %v3870_v41 = vld [vmem:[#allocation5 + $0x50c] ss:$16 sps:$4 sm:$0xff]   ;;  %v3865_v42 = vld [vmem:[#allocation5 + $0x500] ss:$16 sps:$4 sm:$0xff]  }
  0xb0   :  { %1536 = vmatpush1.bf16.msra.mxu0 %v3773_v43  ;;  %1700 = vmatpush1.bf16.msra.mxu1 %v3776_v44  ;;  %v3868_v43 = vld [vmem:[#allocation5 + $0x508] ss:$16 sps:$4 sm:$0xff]   ;;  %v3873_v44 = vld [vmem:[#allocation5 + $0x524] ss:$16 sps:$4 sm:$0xff]  }
  0xb1   :  { %1537 = vmatprep.subr.bf16.mxu0 %v3781_v45  ;;  %1701 = vmatprep.subr.bf16.mxu1 %v3784_v46  ;;  %v3876_v45 = vld [vmem:[#allocation5 + $0x52c] ss:$16 sps:$4 sm:$0xff]   ;;  %v3871_v46 = vld [vmem:[#allocation5 + $0x520] ss:$16 sps:$4 sm:$0xff]  }
  0xb4   :  { %1538 = vmatpush1.bf16.msra.mxu0 %v3779_v47  ;;  %1702 = vmatpush1.bf16.msra.mxu1 %v3782_v48  ;;  %v3874_v47 = vld [vmem:[#allocation5 + $0x528] ss:$16 sps:$4 sm:$0xff]   ;;  %v3879_v48 = vld [vmem:[#allocation5 + $0x544] ss:$16 sps:$4 sm:$0xff]  }
  0xb5   :  { %1539 = vmatprep.subr.bf16.mxu0 %v3787_v49  ;;  %1703 = vmatprep.subr.bf16.mxu1 %v3790_v50  ;;  %v3882_v49 = vld [vmem:[#allocation5 + $0x54c] ss:$16 sps:$4 sm:$0xff]   ;;  %v3877_v50 = vld [vmem:[#allocation5 + $0x540] ss:$16 sps:$4 sm:$0xff]  }
  0xb8   :  { %1540 = vmatpush1.bf16.msra.mxu0 %v3785_v51  ;;  %1704 = vmatpush1.bf16.msra.mxu1 %v3788_v52  ;;  %v3880_v51 = vld [vmem:[#allocation5 + $0x548] ss:$16 sps:$4 sm:$0xff]   ;;  %v3885_v52 = vld [vmem:[#allocation5 + $0x564] ss:$16 sps:$4 sm:$0xff]  }
  0xb9   :  { %1541 = vmatprep.subr.bf16.mxu0 %v3793_v53  ;;  %1705 = vmatprep.subr.bf16.mxu1 %v3796_v54  ;;  %v3888_v53 = vld [vmem:[#allocation5 + $0x56c] ss:$16 sps:$4 sm:$0xff]   ;;  %v3883_v54 = vld [vmem:[#allocation5 + $0x560] ss:$16 sps:$4 sm:$0xff]  }
  0xbc   :  { %1542 = vmatpush1.bf16.msra.mxu0 %v3791_v55  ;;  %1706 = vmatpush1.bf16.msra.mxu1 %v3794_v56  ;;  %v3886_v55 = vld [vmem:[#allocation5 + $0x568] ss:$16 sps:$4 sm:$0xff]   ;;  %v3891_v56 = vld [vmem:[#allocation5 + $0x584] ss:$16 sps:$4 sm:$0xff]  }
  0xbd   :  { %1543 = vmatprep.subr.bf16.mxu0 %v3799_v57  ;;  %1707 = vmatprep.subr.bf16.mxu1 %v3802_v58  ;;  %v3894_v57 = vld [vmem:[#allocation5 + $0x58c] ss:$16 sps:$4 sm:$0xff]   ;;  %v3889_v58 = vld [vmem:[#allocation5 + $0x580] ss:$16 sps:$4 sm:$0xff]  }
  0xc0   :  { %1544 = vmatpush1.bf16.msra.mxu0 %v3797_v59  ;;  %1708 = vmatpush1.bf16.msra.mxu1 %v3800_v60  ;;  %v3892_v59 = vld [vmem:[#allocation5 + $0x588] ss:$16 sps:$4 sm:$0xff]   ;;  %v3897_v60 = vld [vmem:[#allocation5 + $0x5a4] ss:$16 sps:$4 sm:$0xff]  }
  0xc1   :  { %1545 = vmatprep.subr.bf16.mxu0 %v3805_v61  ;;  %1709 = vmatprep.subr.bf16.mxu1 %v3808_v62  ;;  %v3900_v61 = vld [vmem:[#allocation5 + $0x5ac] ss:$16 sps:$4 sm:$0xff]   ;;  %v3895_v62 = vld [vmem:[#allocation5 + $0x5a0] ss:$16 sps:$4 sm:$0xff]  }
  0xc4   :  { %1546 = vmatpush1.bf16.msra.mxu0 %v3803_v63  ;;  %1710 = vmatpush1.bf16.msra.mxu1 %v3806_v0  ;;  %v3898_v63 = vld [vmem:[#allocation5 + $0x5a8] ss:$16 sps:$4 sm:$0xff]   ;;  %v3903_v0 = vld [vmem:[#allocation5 + $0x5c4] ss:$16 sps:$4 sm:$0xff]  }
  0xc5   :  { %1547 = vmatprep.subr.bf16.mxu0 %v3811_v1  ;;  %1711 = vmatprep.subr.bf16.mxu1 %v3814_v2  ;;  %v3906_v1 = vld [vmem:[#allocation5 + $0x5cc] ss:$16 sps:$4 sm:$0xff]   ;;  %v3901_v2 = vld [vmem:[#allocation5 + $0x5c0] ss:$16 sps:$4 sm:$0xff]  }
  0xc8   :  { %1548 = vmatpush1.bf16.msra.mxu0 %v3809_v3  ;;  %1712 = vmatpush1.bf16.msra.mxu1 %v3812_v4  ;;  %v3904_v3 = vld [vmem:[#allocation5 + $0x5c8] ss:$16 sps:$4 sm:$0xff]   ;;  %v3909_v4 = vld [vmem:[#allocation5 + $0x5e4] ss:$16 sps:$4 sm:$0xff]  }
  0xc9   :  { %1558 = vmatprep.subr.bf16.mxu0 %v3819_v5  ;;  %1722 = vmatprep.subr.bf16.mxu1 %v3822_v6  ;;  %v3912_v5 = vld [vmem:[#allocation5 + $0x5ec] ss:$16 sps:$4 sm:$0xff]   ;;  %v3907_v6 = vld [vmem:[#allocation5 + $0x5e0] ss:$16 sps:$4 sm:$0xff]  }
  0xcb   :  { %1550 = vmatmul.mubr.bf16.vlgmr.msra.gmra.mrb[0].mxu0 %v3137_v7  ;;  %1714 = vmatmul.mubr.bf16.vlgmr.msra.gmra.mrb[0].mxu1 %v3137_v7  ;;  %v3910_v7 = vld [vmem:[#allocation5 + $0x5e8] ss:$16 sps:$4 sm:$0xff]  }
  0xcc   :  { %1559 = vmatpush1.bf16.msra.mxu0 %v3817_v8  ;;  %1723 = vmatpush1.bf16.msra.mxu1 %v3820_v9  ;;  %v3917_v8 = vld [vmem:[#allocation5 + $0x604] ss:$16 sps:$4 sm:$0xff]   ;;  %v3920_v9 = vld [vmem:[#allocation5 + $0x60c] ss:$16 sps:$4 sm:$0xff]  }
  0xcd   :  { %1560 = vmatprep.subr.bf16.mxu0 %v3825_v10  ;;  %1724 = vmatprep.subr.bf16.mxu1 %v3828_v12  ;;  %v3915_v10 = vld [vmem:[#allocation5 + $0x600] ss:$16 sps:$4 sm:$0xff]   ;;  %v3918_v12 = vld [vmem:[#allocation5 + $0x608] ss:$16 sps:$4 sm:$0xff]  }
  0xce   :  { %1590 = vmatprep.mubr.bf16.mxu0 %v3140_v13  ;;  %1754 = vmatprep.mubr.bf16.mxu1 %v3140_v13  ;;  %v3139_v13 = vcombine.low %v4416_v11, %v4416_v11  ;;  %v3935_v11 = vld [vmem:[#allocation5 + $0x664] ss:$16 sps:$4 sm:$0xff]  }
  0xd0   :  { %1561 = vmatpush1.bf16.msra.mxu0 %v3823_v14  ;;  %1725 = vmatpush1.bf16.msra.mxu1 %v3826_v15  ;;  %v3923_v14 = vld [vmem:[#allocation5 + $0x624] ss:$16 sps:$4 sm:$0xff]   ;;  %v3926_v15 = vld [vmem:[#allocation5 + $0x62c] ss:$16 sps:$4 sm:$0xff]  }
  0xd1   :  { %1562 = vmatprep.subr.bf16.mxu0 %v3831_v16  ;;  %1726 = vmatprep.subr.bf16.mxu1 %v3834_v17  ;;  %v3921_v16 = vld [vmem:[#allocation5 + $0x620] ss:$16 sps:$4 sm:$0xff]   ;;  %v3924_v17 = vld [vmem:[#allocation5 + $0x628] ss:$16 sps:$4 sm:$0xff]  }
  0xd4   :  { %1563 = vmatpush1.bf16.msra.mxu0 %v3829_v18  ;;  %1727 = vmatpush1.bf16.msra.mxu1 %v3832_v19  ;;  %v3929_v18 = vld [vmem:[#allocation5 + $0x644] ss:$16 sps:$4 sm:$0xff]   ;;  %v3932_v19 = vld [vmem:[#allocation5 + $0x64c] ss:$16 sps:$4 sm:$0xff]  }
  0xd5   :  { %1564 = vmatprep.subr.bf16.mxu0 %v3837_v20  ;;  %1728 = vmatprep.subr.bf16.mxu1 %v3840_v21  ;;  %v3927_v20 = vld [vmem:[#allocation5 + $0x640] ss:$16 sps:$4 sm:$0xff]   ;;  %v3930_v21 = vld [vmem:[#allocation5 + $0x648] ss:$16 sps:$4 sm:$0xff]  }
  0xd8   :  { %1565 = vmatpush1.bf16.msra.mxu0 %v3835_v22  ;;  %1729 = vmatpush1.bf16.msra.mxu1 %v3838_v23  ;;  %v4314_v22 = vmov 0   ;;  %v3938_v23 = vld [vmem:[#allocation5 + $0x66c] ss:$16 sps:$4 sm:$0xff]  }
  0xd9   :  { %1566 = vmatprep.subr.bf16.mxu0 %v3843_v24  ;;  %1730 = vmatprep.subr.bf16.mxu1 %v3846_v25  ;;  %v3933_v24 = vld [vmem:[#allocation5 + $0x660] ss:$16 sps:$4 sm:$0xff]   ;;  %v3936_v25 = vld [vmem:[#allocation5 + $0x668] ss:$16 sps:$4 sm:$0xff]  }
  0xdc   :  { %1567 = vmatpush1.bf16.msra.mxu0 %v3841_v26  ;;  %1731 = vmatpush1.bf16.msra.mxu1 %v3844_v27  ;;  %v3941_v26 = vld [vmem:[#allocation5 + $0x684] ss:$16 sps:$4 sm:$0xff]   ;;  %v3944_v27 = vld [vmem:[#allocation5 + $0x68c] ss:$16 sps:$4 sm:$0xff]  }
  0xdd   :  { %1568 = vmatprep.subr.bf16.mxu0 %v3849_v28  ;;  %1732 = vmatprep.subr.bf16.mxu1 %v3852_v29  ;;  %v3939_v28 = vld [vmem:[#allocation5 + $0x680] ss:$16 sps:$4 sm:$0xff]   ;;  %v3942_v29 = vld [vmem:[#allocation5 + $0x688] ss:$16 sps:$4 sm:$0xff]  }
  0xe0   :  { %1569 = vmatpush1.bf16.msra.mxu0 %v3847_v30  ;;  %1733 = vmatpush1.bf16.msra.mxu1 %v3850_v31  ;;  %v3947_v30 = vld [vmem:[#allocation5 + $0x6a4] ss:$16 sps:$4 sm:$0xff]   ;;  %v3950_v31 = vld [vmem:[#allocation5 + $0x6ac] ss:$16 sps:$4 sm:$0xff]  }
  0xe1   :  { %1570 = vmatprep.subr.bf16.mxu0 %v3855_v32  ;;  %1734 = vmatprep.subr.bf16.mxu1 %v3858_v33  ;;  %v3945_v32 = vld [vmem:[#allocation5 + $0x6a0] ss:$16 sps:$4 sm:$0xff]   ;;  %v3948_v33 = vld [vmem:[#allocation5 + $0x6a8] ss:$16 sps:$4 sm:$0xff]  }
  0xe4   :  { %1571 = vmatpush1.bf16.msra.mxu0 %v3853_v34  ;;  %1735 = vmatpush1.bf16.msra.mxu1 %v3856_v35  ;;  %v3953_v34 = vld [vmem:[#allocation5 + $0x6c4] ss:$16 sps:$4 sm:$0xff]   ;;  %v3956_v35 = vld [vmem:[#allocation5 + $0x6cc] ss:$16 sps:$4 sm:$0xff]  }
  0xe5   :  { %1572 = vmatprep.subr.bf16.mxu0 %v3861_v36  ;;  %1736 = vmatprep.subr.bf16.mxu1 %v3864_v37  ;;  %v3951_v36 = vld [vmem:[#allocation5 + $0x6c0] ss:$16 sps:$4 sm:$0xff]   ;;  %v3954_v37 = vld [vmem:[#allocation5 + $0x6c8] ss:$16 sps:$4 sm:$0xff]  }
  0xe8   :  { %1573 = vmatpush1.bf16.msra.mxu0 %v3859_v38  ;;  %1737 = vmatpush1.bf16.msra.mxu1 %v3862_v39  ;;  %v3959_v38 = vld [vmem:[#allocation5 + $0x6e4] ss:$16 sps:$4 sm:$0xff]   ;;  %v3962_v39 = vld [vmem:[#allocation5 + $0x6ec] ss:$16 sps:$4 sm:$0xff]  }
  0xe9   :  { %1574 = vmatprep.subr.bf16.mxu0 %v3867_v40  ;;  %1738 = vmatprep.subr.bf16.mxu1 %v3870_v41  ;;  %v3957_v40 = vld [vmem:[#allocation5 + $0x6e0] ss:$16 sps:$4 sm:$0xff]   ;;  %v3960_v41 = vld [vmem:[#allocation5 + $0x6e8] ss:$16 sps:$4 sm:$0xff]  }
  0xec   :  { %1575 = vmatpush1.bf16.msra.mxu0 %v3865_v42  ;;  %1739 = vmatpush1.bf16.msra.mxu1 %v3868_v43  ;;  %v3966_v42 = vld [vmem:[#allocation7 + $0x4] ss:$16 sps:$4 sm:$0xff]   ;;  %v3969_v43 = vld [vmem:[#allocation7 + $0xc] ss:$16 sps:$4 sm:$0xff]  }
  0xed   :  { %1576 = vmatprep.subr.bf16.mxu0 %v3873_v44  ;;  %1740 = vmatprep.subr.bf16.mxu1 %v3876_v45  ;;  %v3963_v44 = vld [vmem:[#allocation2 + $0x18] ss:$0 sps:$4 sm:$0xff]   ;;  %v3964_v45 = vld [vmem:[#allocation7] ss:$16 sps:$4 sm:$0xff]  }
  0xf0   :  { %1577 = vmatpush1.bf16.msra.mxu0 %v3871_v46  ;;  %1741 = vmatpush1.bf16.msra.mxu1 %v3874_v47  ;;  %v3967_v46 = vld [vmem:[#allocation7 + $0x8] ss:$16 sps:$4 sm:$0xff]   ;;  %v3972_v47 = vld [vmem:[#allocation7 + $0x24] ss:$16 sps:$4 sm:$0xff]  }
  0xf1   :  { %1578 = vmatprep.subr.bf16.mxu0 %v3879_v48  ;;  %1742 = vmatprep.subr.bf16.mxu1 %v3882_v49  ;;  %v3975_v48 = vld [vmem:[#allocation7 + $0x2c] ss:$16 sps:$4 sm:$0xff]   ;;  %v3970_v49 = vld [vmem:[#allocation7 + $0x20] ss:$16 sps:$4 sm:$0xff]  }
  0xf4   :  { %1579 = vmatpush1.bf16.msra.mxu0 %v3877_v50  ;;  %1743 = vmatpush1.bf16.msra.mxu1 %v3880_v51  ;;  %v3973_v50 = vld [vmem:[#allocation7 + $0x28] ss:$16 sps:$4 sm:$0xff]   ;;  %v3978_v51 = vld [vmem:[#allocation7 + $0x44] ss:$16 sps:$4 sm:$0xff]  }
  0xf5   :  { %1580 = vmatprep.subr.bf16.mxu0 %v3885_v52  ;;  %1744 = vmatprep.subr.bf16.mxu1 %v3888_v53  ;;  %v3981_v52 = vld [vmem:[#allocation7 + $0x4c] ss:$16 sps:$4 sm:$0xff]   ;;  %v3976_v53 = vld [vmem:[#allocation7 + $0x40] ss:$16 sps:$4 sm:$0xff]  }
  0xf8   :  { %1581 = vmatpush1.bf16.msra.mxu0 %v3883_v54  ;;  %1745 = vmatpush1.bf16.msra.mxu1 %v3886_v55  ;;  %v3979_v54 = vld [vmem:[#allocation7 + $0x48] ss:$16 sps:$4 sm:$0xff]   ;;  %v3984_v55 = vld [vmem:[#allocation7 + $0x64] ss:$16 sps:$4 sm:$0xff]  }
  0xf9   :  { %1582 = vmatprep.subr.bf16.mxu0 %v3891_v56  ;;  %1746 = vmatprep.subr.bf16.mxu1 %v3894_v57  ;;  %v3987_v56 = vld [vmem:[#allocation7 + $0x6c] ss:$16 sps:$4 sm:$0xff]   ;;  %v3982_v57 = vld [vmem:[#allocation7 + $0x60] ss:$16 sps:$4 sm:$0xff]  }
  0xfc   :  { %1583 = vmatpush1.bf16.msra.mxu0 %v3889_v58  ;;  %1747 = vmatpush1.bf16.msra.mxu1 %v3892_v59  ;;  %v3985_v58 = vld [vmem:[#allocation7 + $0x68] ss:$16 sps:$4 sm:$0xff]   ;;  %v3990_v59 = vld [vmem:[#allocation7 + $0x84] ss:$16 sps:$4 sm:$0xff]  }
  0xfd   :  { %1584 = vmatprep.subr.bf16.mxu0 %v3897_v60  ;;  %1748 = vmatprep.subr.bf16.mxu1 %v3900_v61  ;;  %v3993_v60 = vld [vmem:[#allocation7 + $0x8c] ss:$16 sps:$4 sm:$0xff]   ;;  %v3988_v61 = vld [vmem:[#allocation7 + $0x80] ss:$16 sps:$4 sm:$0xff]  }
 0x100   :  { %1585 = vmatpush1.bf16.msra.mxu0 %v3895_v62  ;;  %1749 = vmatpush1.bf16.msra.mxu1 %v3898_v63  ;;  %v3991_v62 = vld [vmem:[#allocation7 + $0x88] ss:$16 sps:$4 sm:$0xff]   ;;  %v3996_v63 = vld [vmem:[#allocation7 + $0xa4] ss:$16 sps:$4 sm:$0xff]  }
 0x101   :  { %1586 = vmatprep.subr.bf16.mxu0 %v3903_v0  ;;  %1750 = vmatprep.subr.bf16.mxu1 %v3906_v1  ;;  %v3999_v0 = vld [vmem:[#allocation7 + $0xac] ss:$16 sps:$4 sm:$0xff]   ;;  %v3994_v1 = vld [vmem:[#allocation7 + $0xa0] ss:$16 sps:$4 sm:$0xff]  }
 0x104   :  { %1587 = vmatpush1.bf16.msra.mxu0 %v3901_v2  ;;  %1751 = vmatpush1.bf16.msra.mxu1 %v3904_v3  ;;  %v3997_v2 = vld [vmem:[#allocation7 + $0xa8] ss:$16 sps:$4 sm:$0xff]   ;;  %v4002_v3 = vld [vmem:[#allocation7 + $0xc4] ss:$16 sps:$4 sm:$0xff]  }
 0x105   :  { %1588 = vmatprep.subr.bf16.mxu0 %v3909_v4  ;;  %1752 = vmatprep.subr.bf16.mxu1 %v3912_v5  ;;  %v4005_v4 = vld [vmem:[#allocation7 + $0xcc] ss:$16 sps:$4 sm:$0xff]   ;;  %v4000_v5 = vld [vmem:[#allocation7 + $0xc0] ss:$16 sps:$4 sm:$0xff]  }
 0x108   :  { %1589 = vmatpush1.bf16.msra.mxu0 %v3907_v6  ;;  %1753 = vmatpush1.bf16.msra.mxu1 %v3910_v7  ;;  %v4003_v6 = vld [vmem:[#allocation7 + $0xc8] ss:$16 sps:$4 sm:$0xff]   ;;  %v4008_v7 = vld [vmem:[#allocation7 + $0xe4] ss:$16 sps:$4 sm:$0xff]  }
 0x109   :  { %1599 = vmatprep.subr.bf16.mxu0 %v3917_v8  ;;  %1763 = vmatprep.subr.bf16.mxu1 %v3920_v9  ;;  %v4011_v8 = vld [vmem:[#allocation7 + $0xec] ss:$16 sps:$4 sm:$0xff]   ;;  %v4006_v9 = vld [vmem:[#allocation7 + $0xe0] ss:$16 sps:$4 sm:$0xff]  }
 0x10b   :  { %1591 = vmatmul.mubr.bf16.vlgmr.msra.gmra.mrb[0].mxu0 %v3139_v13  ;;  %1755 = vmatmul.mubr.bf16.vlgmr.msra.gmra.mrb[0].mxu1 %v3139_v13  ;;  %v4017_v13 = vld [vmem:[#allocation7 + $0x10c] ss:$16 sps:$4 sm:$0xff]  }
 0x10c   :  { %1600 = vmatpush1.bf16.msra.mxu0 %v3915_v10  ;;  %1764 = vmatpush1.bf16.msra.mxu1 %v3918_v12  ;;  %v4009_v10 = vld [vmem:[#allocation7 + $0xe8] ss:$16 sps:$4 sm:$0xff]   ;;  %v4014_v12 = vld [vmem:[#allocation7 + $0x104] ss:$16 sps:$4 sm:$0xff]  }
 0x10d   :  { %1601 = vmatprep.subr.bf16.mxu0 %v3923_v14  ;;  %1765 = vmatprep.subr.bf16.mxu1 %v3926_v15  ;;  %v4012_v14 = vld [vmem:[#allocation7 + $0x100] ss:$16 sps:$4 sm:$0xff]   ;;  %v4015_v15 = vld [vmem:[#allocation7 + $0x108] ss:$16 sps:$4 sm:$0xff]  }
 0x10e   :  { %1631 = vmatprep.mubr.bf16.mxu0 %v4314_v22  ;;  %1795 = vmatprep.mubr.bf16.mxu1 %v4314_v22  ;;  %v4024_v22 = vld [vmem:[#allocation7 + $0x140] ss:$16 sps:$4 sm:$0xff]  }
 0x110   :  { %1602 = vmatpush1.bf16.msra.mxu0 %v3921_v16  ;;  %1766 = vmatpush1.bf16.msra.mxu1 %v3924_v17  ;;  %v4020_v16 = vld [vmem:[#allocation7 + $0x124] ss:$16 sps:$4 sm:$0xff]   ;;  %v4023_v17 = vld [vmem:[#allocation7 + $0x12c] ss:$16 sps:$4 sm:$0xff]  }
 0x111   :  { %1603 = vmatprep.subr.bf16.mxu0 %v3929_v18  ;;  %1767 = vmatprep.subr.bf16.mxu1 %v3932_v19  ;;  %v4018_v18 = vld [vmem:[#allocation7 + $0x120] ss:$16 sps:$4 sm:$0xff]   ;;  %v4021_v19 = vld [vmem:[#allocation7 + $0x128] ss:$16 sps:$4 sm:$0xff]  }
 0x114   :  { %1604 = vmatpush1.bf16.msra.mxu0 %v3927_v20  ;;  %1768 = vmatpush1.bf16.msra.mxu1 %v3930_v21  ;;  %v4026_v20 = vld [vmem:[#allocation7 + $0x144] ss:$16 sps:$4 sm:$0xff]   ;;  %v4029_v21 = vld [vmem:[#allocation7 + $0x14c] ss:$16 sps:$4 sm:$0xff]  }
 0x115   :  { %1605 = vmatprep.subr.bf16.mxu0 %v3935_v11  ;;  %1769 = vmatprep.subr.bf16.mxu1 %v3938_v23  ;;  %v4027_v11 = vld [vmem:[#allocation7 + $0x148] ss:$16 sps:$4 sm:$0xff]   ;;  %v4032_v23 = vld [vmem:[#allocation7 + $0x164] ss:$16 sps:$4 sm:$0xff]  }
 0x118   :  { %1606 = vmatpush1.bf16.msra.mxu0 %v3933_v24  ;;  %1770 = vmatpush1.bf16.msra.mxu1 %v3936_v25  ;;  %v4035_v24 = vld [vmem:[#allocation7 + $0x16c] ss:$16 sps:$4 sm:$0xff]   ;;  %v4030_v25 = vld [vmem:[#allocation7 + $0x160] ss:$16 sps:$4 sm:$0xff]  }
 0x119   :  { %1607 = vmatprep.subr.bf16.mxu0 %v3941_v26  ;;  %1771 = vmatprep.subr.bf16.mxu1 %v3944_v27  ;;  %v4033_v26 = vld [vmem:[#allocation7 + $0x168] ss:$16 sps:$4 sm:$0xff]   ;;  %v4038_v27 = vld [vmem:[#allocation7 + $0x184] ss:$16 sps:$4 sm:$0xff]  }
 0x11c   :  { %1608 = vmatpush1.bf16.msra.mxu0 %v3939_v28  ;;  %1772 = vmatpush1.bf16.msra.mxu1 %v3942_v29  ;;  %v4041_v28 = vld [vmem:[#allocation7 + $0x18c] ss:$16 sps:$4 sm:$0xff]   ;;  %v4036_v29 = vld [vmem:[#allocation7 + $0x180] ss:$16 sps:$4 sm:$0xff]  }
 0x11d   :  { %1609 = vmatprep.subr.bf16.mxu0 %v3947_v30  ;;  %1773 = vmatprep.subr.bf16.mxu1 %v3950_v31  ;;  %v4039_v30 = vld [vmem:[#allocation7 + $0x188] ss:$16 sps:$4 sm:$0xff]   ;;  %v4044_v31 = vld [vmem:[#allocation7 + $0x1a4] ss:$16 sps:$4 sm:$0xff]  }
 0x120   :  { %1610 = vmatpush1.bf16.msra.mxu0 %v3945_v32  ;;  %1774 = vmatpush1.bf16.msra.mxu1 %v3948_v33  ;;  %v4047_v32 = vld [vmem:[#allocation7 + $0x1ac] ss:$16 sps:$4 sm:$0xff]   ;;  %v4042_v33 = vld [vmem:[#allocation7 + $0x1a0] ss:$16 sps:$4 sm:$0xff]  }
 0x121   :  { %1611 = vmatprep.subr.bf16.mxu0 %v3953_v34  ;;  %1775 = vmatprep.subr.bf16.mxu1 %v3956_v35  ;;  %v4045_v34 = vld [vmem:[#allocation7 + $0x1a8] ss:$16 sps:$4 sm:$0xff]   ;;  %v4050_v35 = vld [vmem:[#allocation7 + $0x1c4] ss:$16 sps:$4 sm:$0xff]  }
 0x124   :  { %1612 = vmatpush1.bf16.msra.mxu0 %v3951_v36  ;;  %1776 = vmatpush1.bf16.msra.mxu1 %v3954_v37  ;;  %v4053_v36 = vld [vmem:[#allocation7 + $0x1cc] ss:$16 sps:$4 sm:$0xff]   ;;  %v4048_v37 = vld [vmem:[#allocation7 + $0x1c0] ss:$16 sps:$4 sm:$0xff]  }
 0x125   :  { %1613 = vmatprep.subr.bf16.mxu0 %v3959_v38  ;;  %1777 = vmatprep.subr.bf16.mxu1 %v3962_v39  ;;  %v4051_v38 = vld [vmem:[#allocation7 + $0x1c8] ss:$16 sps:$4 sm:$0xff]   ;;  %v4056_v39 = vld [vmem:[#allocation7 + $0x1e4] ss:$16 sps:$4 sm:$0xff]  }
 0x128   :  { %1614 = vmatpush1.bf16.msra.mxu0 %v3957_v40  ;;  %1778 = vmatpush1.bf16.msra.mxu1 %v3960_v41  ;;  %v4059_v40 = vld [vmem:[#allocation7 + $0x1ec] ss:$16 sps:$4 sm:$0xff]   ;;  %v4054_v41 = vld [vmem:[#allocation7 + $0x1e0] ss:$16 sps:$4 sm:$0xff]  }
 0x129   :  { %2602 = vmatprep.subr.bf16.mxu0 %v3966_v42  ;;  %2684 = vmatprep.subr.bf16.mxu1 %v3969_v43  ;;  %v4057_v42 = vld [vmem:[#allocation7 + $0x1e8] ss:$16 sps:$4 sm:$0xff]   ;;  %v4062_v43 = vld [vmem:[#allocation7 + $0x204] ss:$16 sps:$4 sm:$0xff]  }
 0x12b   :  { %1632 = vmatmul.mubr.bf16.vlgmr.msra.gmra.mrb[0].mxu0 %v3963_v44  ;;  %1796 = vmatmul.mubr.bf16.vlgmr.msra.gmra.mrb[0].mxu1 %v3963_v44  ;;  %v4065_v44 = vld [vmem:[#allocation7 + $0x20c] ss:$16 sps:$4 sm:$0xff]  }
 0x12c   :  { %2603 = vmatpush1.bf16.msra.mxu0 %v3964_v45  ;;  %2685 = vmatpush1.bf16.msra.mxu1 %v3967_v46  ;;  %v311_v45 = vlaneseq }
 0x12d   :  { %2604 = vmatprep.subr.bf16.mxu0 %v3972_v47  ;;  %2686 = vmatprep.subr.bf16.mxu1 %v3975_v48  ;;  %v4428_v48 = vld [vmem:[%s4476_s2] sm:$0xf] }
 0x12e   :  { %v4422_v46 = vshrl.u32 %v311_v45, 7  ;;  %v4122_v45 = vld [vmem:[#allocation7 + $0x344] ss:$16 sps:$4 sm:$0xff]  }
 0x130   :  { %2605 = vmatpush1.bf16.msra.mxu0 %v3970_v49  ;;  %2687 = vmatpush1.bf16.msra.mxu1 %v3973_v50  ;;  %v313_v47 = vsub.s32 0, %v4422_v46  ;;  %v317_v49 = vsub.s32 1, %v4422_v46  ;;  %v325_v50 = vsub.s32 3, %v4422_v46 }
 0x131   :  { %2606 = vmatprep.subr.bf16.mxu0 %v3978_v51  ;;  %2688 = vmatprep.subr.bf16.mxu1 %v3981_v52 }
 0x132   :  { %v314_v51 = vrot.slane %v4428_v48, %v313_v47  ;;  %v318_v52 = vrot.slane %v4428_v48, %v317_v49 }
 0x134   :  { %2607 = vmatpush1.bf16.msra.mxu0 %v3976_v53  ;;  %2689 = vmatpush1.bf16.msra.mxu1 %v3979_v54  ;;  %v326_v53 = vrot.slane %v4428_v48, %v325_v50 }
 0x135   :  { %2608 = vmatprep.subr.bf16.mxu0 %v3984_v55  ;;  %2690 = vmatprep.subr.bf16.mxu1 %v3987_v56 }
 0x138   :  { %2609 = vmatpush1.bf16.msra.mxu0 %v3982_v57  ;;  %2691 = vmatpush1.bf16.msra.mxu1 %v3985_v58 }
 0x139   :  { %2610 = vmatprep.subr.bf16.mxu0 %v3990_v59  ;;  %2692 = vmatprep.subr.bf16.mxu1 %v3993_v60 }
 0x13c   :  { %2611 = vmatpush1.bf16.msra.mxu0 %v3988_v61  ;;  %2693 = vmatpush1.bf16.msra.mxu1 %v3991_v62 }
 0x13d   :  { %2612 = vmatprep.subr.bf16.mxu0 %v3996_v63  ;;  %2694 = vmatprep.subr.bf16.mxu1 %v3999_v0 }
 0x140   :  { %2613 = vmatpush1.bf16.msra.mxu0 %v3994_v1  ;;  %2695 = vmatpush1.bf16.msra.mxu1 %v3997_v2 }
 0x141   :  { %2614 = vmatprep.subr.bf16.mxu0 %v4002_v3  ;;  %2696 = vmatprep.subr.bf16.mxu1 %v4005_v4 }
 0x144   :  { %2615 = vmatpush1.bf16.msra.mxu0 %v4000_v5  ;;  %2697 = vmatpush1.bf16.msra.mxu1 %v4003_v6  ;;  %v4060_v5 = vld [vmem:[#allocation7 + $0x200] ss:$16 sps:$4 sm:$0xff]   ;;  %v4063_v6 = vld [vmem:[#allocation7 + $0x208] ss:$16 sps:$4 sm:$0xff]  }
 0x145   :  { %2616 = vmatprep.subr.bf16.mxu0 %v4008_v7  ;;  %2698 = vmatprep.subr.bf16.mxu1 %v4011_v8  ;;  %v4068_v8 = vld [vmem:[#allocation7 + $0x224] ss:$16 sps:$4 sm:$0xff]  }
 0x148   :  { %2617 = vmatpush1.bf16.msra.mxu0 %v4006_v9  ;;  %2699 = vmatpush1.bf16.msra.mxu1 %v4009_v10  ;;  %v4071_v9 = vld [vmem:[#allocation7 + $0x22c] ss:$16 sps:$4 sm:$0xff]  }
 0x149   :  { %2618 = vmatprep.subr.bf16.mxu0 %v4014_v12  ;;  %2700 = vmatprep.subr.bf16.mxu1 %v4017_v13  ;;  %v4066_v12 = vld [vmem:[#allocation7 + $0x220] ss:$16 sps:$4 sm:$0xff]   ;;  %v4069_v13 = vld [vmem:[#allocation7 + $0x228] ss:$16 sps:$4 sm:$0xff]  }
 0x14c   :  { %2619 = vmatpush1.bf16.msra.mxu0 %v4012_v14  ;;  %2701 = vmatpush1.bf16.msra.mxu1 %v4015_v15  ;;  %v4074_v14 = vld [vmem:[#allocation7 + $0x244] ss:$16 sps:$4 sm:$0xff]   ;;  %v4077_v15 = vld [vmem:[#allocation7 + $0x24c] ss:$16 sps:$4 sm:$0xff]  }
 0x14d   :  { %2620 = vmatprep.subr.bf16.mxu0 %v4020_v16  ;;  %2702 = vmatprep.subr.bf16.mxu1 %v4023_v17  ;;  %v4072_v16 = vld [vmem:[#allocation7 + $0x240] ss:$16 sps:$4 sm:$0xff]   ;;  %v4075_v17 = vld [vmem:[#allocation7 + $0x248] ss:$16 sps:$4 sm:$0xff]  }
 0x150   :  { %2621 = vmatpush1.bf16.msra.mxu0 %v4018_v18  ;;  %2703 = vmatpush1.bf16.msra.mxu1 %v4021_v19  ;;  %v4080_v18 = vld [vmem:[#allocation7 + $0x264] ss:$16 sps:$4 sm:$0xff]   ;;  %v4083_v19 = vld [vmem:[#allocation7 + $0x26c] ss:$16 sps:$4 sm:$0xff]  }
 0x151   :  { %2622 = vmatprep.subr.bf16.mxu0 %v4026_v20  ;;  %2704 = vmatprep.subr.bf16.mxu1 %v4029_v21  ;;  %v4078_v20 = vld [vmem:[#allocation7 + $0x260] ss:$16 sps:$4 sm:$0xff]   ;;  %v4081_v21 = vld [vmem:[#allocation7 + $0x268] ss:$16 sps:$4 sm:$0xff]  }
 0x154   :  { %2623 = vmatpush1.bf16.msra.mxu0 %v4024_v22  ;;  %2705 = vmatpush1.bf16.msra.mxu1 %v4027_v11  ;;  %v4086_v22 = vld [vmem:[#allocation7 + $0x284] ss:$16 sps:$4 sm:$0xff]   ;;  %v4089_v11 = vld [vmem:[#allocation7 + $0x28c] ss:$16 sps:$4 sm:$0xff]  }
 0x155   :  { %2624 = vmatprep.subr.bf16.mxu0 %v4032_v23  ;;  %2706 = vmatprep.subr.bf16.mxu1 %v4035_v24  ;;  %v4084_v23 = vld [vmem:[#allocation7 + $0x280] ss:$16 sps:$4 sm:$0xff]   ;;  %v4087_v24 = vld [vmem:[#allocation7 + $0x288] ss:$16 sps:$4 sm:$0xff]  }
 0x158   :  { %2625 = vmatpush1.bf16.msra.mxu0 %v4030_v25  ;;  %2707 = vmatpush1.bf16.msra.mxu1 %v4033_v26  ;;  %v4092_v25 = vld [vmem:[#allocation7 + $0x2a4] ss:$16 sps:$4 sm:$0xff]   ;;  %v4095_v26 = vld [vmem:[#allocation7 + $0x2ac] ss:$16 sps:$4 sm:$0xff]  }
 0x159   :  { %2626 = vmatprep.subr.bf16.mxu0 %v4038_v27  ;;  %2708 = vmatprep.subr.bf16.mxu1 %v4041_v28  ;;  %v4090_v27 = vld [vmem:[#allocation7 + $0x2a0] ss:$16 sps:$4 sm:$0xff]   ;;  %v4093_v28 = vld [vmem:[#allocation7 + $0x2a8] ss:$16 sps:$4 sm:$0xff]  }
 0x15c   :  { %2627 = vmatpush1.bf16.msra.mxu0 %v4036_v29  ;;  %2709 = vmatpush1.bf16.msra.mxu1 %v4039_v30  ;;  %v4098_v29 = vld [vmem:[#allocation7 + $0x2c4] ss:$16 sps:$4 sm:$0xff]   ;;  %v4101_v30 = vld [vmem:[#allocation7 + $0x2cc] ss:$16 sps:$4 sm:$0xff]  }
 0x15d   :  { %2628 = vmatprep.subr.bf16.mxu0 %v4044_v31  ;;  %2710 = vmatprep.subr.bf16.mxu1 %v4047_v32  ;;  %v4096_v31 = vld [vmem:[#allocation7 + $0x2c0] ss:$16 sps:$4 sm:$0xff]   ;;  %v4099_v32 = vld [vmem:[#allocation7 + $0x2c8] ss:$16 sps:$4 sm:$0xff]  }
 0x160   :  { %2629 = vmatpush1.bf16.msra.mxu0 %v4042_v33  ;;  %2711 = vmatpush1.bf16.msra.mxu1 %v4045_v34  ;;  %v4104_v33 = vld [vmem:[#allocation7 + $0x2e4] ss:$16 sps:$4 sm:$0xff]   ;;  %v4107_v34 = vld [vmem:[#allocation7 + $0x2ec] ss:$16 sps:$4 sm:$0xff]  }
 0x161   :  { %2630 = vmatprep.subr.bf16.mxu0 %v4050_v35  ;;  %2712 = vmatprep.subr.bf16.mxu1 %v4053_v36  ;;  %v4102_v35 = vld [vmem:[#allocation7 + $0x2e0] ss:$16 sps:$4 sm:$0xff]   ;;  %v4105_v36 = vld [vmem:[#allocation7 + $0x2e8] ss:$16 sps:$4 sm:$0xff]  }
 0x164   :  { %2631 = vmatpush1.bf16.msra.mxu0 %v4048_v37  ;;  %2713 = vmatpush1.bf16.msra.mxu1 %v4051_v38  ;;  %v4110_v37 = vld [vmem:[#allocation7 + $0x304] ss:$16 sps:$4 sm:$0xff]   ;;  %v4113_v38 = vld [vmem:[#allocation7 + $0x30c] ss:$16 sps:$4 sm:$0xff]  }
 0x165   :  { %2632 = vmatprep.subr.bf16.mxu0 %v4056_v39  ;;  %2714 = vmatprep.subr.bf16.mxu1 %v4059_v40  ;;  %v4108_v39 = vld [vmem:[#allocation7 + $0x300] ss:$16 sps:$4 sm:$0xff]   ;;  %v4111_v40 = vld [vmem:[#allocation7 + $0x308] ss:$16 sps:$4 sm:$0xff]  }
 0x168   :  { %2633 = vmatpush1.bf16.msra.mxu0 %v4054_v41  ;;  %2715 = vmatpush1.bf16.msra.mxu1 %v4057_v42  ;;  %v4116_v41 = vld [vmem:[#allocation7 + $0x324] ss:$16 sps:$4 sm:$0xff]   ;;  %v4119_v42 = vld [vmem:[#allocation7 + $0x32c] ss:$16 sps:$4 sm:$0xff]  }
 0x169   :  { %2643 = vmatprep.subr.bf16.mxu0 %v4062_v43  ;;  %2725 = vmatprep.subr.bf16.mxu1 %v4065_v44  ;;  %v4114_v43 = vld [vmem:[#allocation7 + $0x320] ss:$16 sps:$4 sm:$0xff]   ;;  %v4117_v44 = vld [vmem:[#allocation7 + $0x328] ss:$16 sps:$4 sm:$0xff]  }
 0x1fe   :  { %v1633_v54 = vpop.f32.mrb[0].mxu0  ;;  %v4441_v55 = vpop.f32.mrb[0].mxu1 }
 0x1ff   :  { %v3571_v56 = vadd.f32 %v1633_v54, %v314_v51  ;;  %v1635_v57 = vpop.f32.mrb[1].mxu0  ;;  %v1799_v58 = vpop.f32.mrb[1].mxu1  ;;  %v4125_v51 = vld [vmem:[#allocation7 + $0x34c] ss:$16 sps:$4 sm:$0xff]   ;;  %v4128_v54 = vld [vmem:[#allocation7 + $0x364] ss:$16 sps:$4 sm:$0xff]  }
 0x200   :  { %v3572_v59 = vadd.f32 %v1635_v57, %v318_v52  ;;  %v3574_v60 = vadd.f32 %v1799_v58, %v326_v53  ;;  %v1637_v61 = vpop.f32.mrb[2].mxu0  ;;  %v1801_v62 = vpop.f32.mrb[2].mxu1  ;;  %v4120_v52 = vld [vmem:[#allocation7 + $0x340] ss:$16 sps:$4 sm:$0xff]   ;;  %v4123_v53 = vld [vmem:[#allocation7 + $0x348] ss:$16 sps:$4 sm:$0xff]  }
 0x201   :  { %v1804_v63 = vmax.f32 %v3571_v56, 0.0  ;;  %v1638_v0 = vpop.f32.mrb[3].mxu0  ;;  %v1802_v1 = vpop.f32.mrb[3].mxu1  ;;  %v4131_v56 = vld [vmem:[#allocation7 + $0x36c] ss:$16 sps:$4 sm:$0xff]  }
 0x202   :  { %v1805_v2 = vmax.f32 %v3572_v59, 0.0  ;;  %v1807_v3 = vmax.f32 %v3574_v60, 0.0  ;;  %v4126_v57 = vld [vmem:[#allocation7 + $0x360] ss:$16 sps:$4 sm:$0xff]   ;;  %v4129_v58 = vld [vmem:[#allocation7 + $0x368] ss:$16 sps:$4 sm:$0xff]  }
 0x203   :  { %v1808_v7 = vpack.c.bf16 %v1804_v63, %v1804_v63  ;;  %v4134_v59 = vld [vmem:[#allocation7 + $0x384] ss:$16 sps:$4 sm:$0xff]   ;;  %v4137_v60 = vld [vmem:[#allocation7 + $0x38c] ss:$16 sps:$4 sm:$0xff]   ;;  %v4132_v61 = vld [vmem:[#allocation7 + $0x380] ss:$16 sps:$4 sm:$0xff]  }
 0x204   :  { %v1809_v4 = vpack.c.bf16 %v1805_v2, %v1805_v2  ;;  %v1811_v10 = vpack.c.bf16 %v1807_v3, %v1807_v3  ;;  %v4135_v62 = vld [vmem:[#allocation7 + $0x388] ss:$16 sps:$4 sm:$0xff]   ;;  %v321_v63 = vsub.s32 2, %v4422_v46  ;;  %v4140_v0 = vld [vmem:[#allocation7 + $0x3a4] ss:$16 sps:$4 sm:$0xff]  }
 0x205   :  { %v4143_v1 = vld [vmem:[#allocation7 + $0x3ac] ss:$16 sps:$4 sm:$0xff]   ;;  %v4138_v2 = vld [vmem:[#allocation7 + $0x3a0] ss:$16 sps:$4 sm:$0xff]   ;;  %v4141_v3 = vld [vmem:[#allocation7 + $0x3a8] ss:$16 sps:$4 sm:$0xff]  }
 0x206   :  { %2634 = vmatprep.mubr.bf16.mxu0 %v1809_v4  ;;  %2716 = vmatprep.mubr.bf16.mxu1 %v1809_v4  ;;  %v322_v4 = vrot.slane %v4428_v48, %v321_v63  ;;  %v4156_v48 = vld [vmem:[#allocation8 + $0x40] sm:$0xff]  }
 0x207   :  { %2635 = vmatmul.mubr.bf16.vlgmr.msra.gmra.mrb[4].mxu0 %v1808_v7  ;;  %2717 = vmatmul.mubr.bf16.vlgmr.msra.gmra.mrb[4].mxu1 %v1808_v7  ;;  %v4144_v7 = vld [vmem:[#allocation7 + $0x3c0] ss:$16 sps:$4 sm:$0xff]  }
 0x208   :  { %2644 = vmatpush1.bf16.msra.mxu0 %v4060_v5  ;;  %2726 = vmatpush1.bf16.msra.mxu1 %v4063_v6  ;;  %v4146_v5 = vld [vmem:[#allocation7 + $0x3c4] ss:$16 sps:$4 sm:$0xff]   ;;  %v4149_v6 = vld [vmem:[#allocation7 + $0x3cc] ss:$16 sps:$4 sm:$0xff]  }
 0x209   :  { %2675 = vmatprep.mubr.bf16.mxu0 %v1811_v10  ;;  %2757 = vmatprep.mubr.bf16.mxu1 %v1811_v10  ;;  %v4152_v10 = vld [vmem:[#allocation7 + $0x3e4] ss:$16 sps:$4 sm:$0xff]  }
 0x20a   :  { %2645 = vmatprep.subr.bf16.mxu0 %v4068_v8  ;;  %2727 = vmatprep.subr.bf16.mxu1 %v4071_v9  ;;  %v4147_v8 = vld [vmem:[#allocation7 + $0x3c8] ss:$16 sps:$4 sm:$0xff]   ;;  %v3573_v9 = vadd.f32 %v4441_v55, %v322_v4 }
 0x20b   :  { %v4160_v55 = vld [vmem:[#allocation8 + $0x48] sm:$0xff]  }
 0x20c   :  { %2646 = vmatpush1.bf16.msra.mxu0 %v4066_v12  ;;  %2728 = vmatpush1.bf16.msra.mxu1 %v4069_v13  ;;  %v4155_v12 = vld [vmem:[#allocation7 + $0x3ec] ss:$16 sps:$4 sm:$0xff]   ;;  %v4150_v13 = vld [vmem:[#allocation7 + $0x3e0] ss:$16 sps:$4 sm:$0xff]  }
 0x20d   :  { %2647 = vmatprep.subr.bf16.mxu0 %v4074_v14  ;;  %2729 = vmatprep.subr.bf16.mxu1 %v4077_v15  ;;  %v4153_v14 = vld [vmem:[#allocation7 + $0x3e8] ss:$16 sps:$4 sm:$0xff]   ;;  %v1806_v15 = vmax.f32 %v3573_v9, 0.0 }
 0x210   :  { %2648 = vmatpush1.bf16.msra.mxu0 %v4072_v16  ;;  %2730 = vmatpush1.bf16.msra.mxu1 %v4075_v17  ;;  %v4157_v16 = vld [vmem:[#allocation8 + $0xc0] sm:$0xff]  }
 0x211   :  { %2649 = vmatprep.subr.bf16.mxu0 %v4080_v18  ;;  %2731 = vmatprep.subr.bf16.mxu1 %v4083_v19  ;;  %v4158_v17 = vld [vmem:[#allocation8] sm:$0xff]   ;;  %v1810_v19 = vpack.c.bf16 %v1806_v15, %v1806_v15 }
 0x212   :  { %v4159_v18 = vld [vmem:[#allocation8 + $0x80] sm:$0xff]  }
 0x214   :  { %2650 = vmatpush1.bf16.msra.mxu0 %v4078_v20  ;;  %2732 = vmatpush1.bf16.msra.mxu1 %v4081_v21  ;;  %v4161_v20 = vld [vmem:[#allocation8 + $0xc8] sm:$0xff]  }
 0x215   :  { %2651 = vmatprep.subr.bf16.mxu0 %v4086_v22  ;;  %2733 = vmatprep.subr.bf16.mxu1 %v4089_v11  ;;  %v4162_v21 = vld [vmem:[#allocation8 + $0x8] sm:$0xff]   ;;  %v4164_v11 = vld [vmem:[#allocation8 + $0x50] sm:$0xff]  }
 0x216   :  { %v4163_v22 = vld [vmem:[#allocation8 + $0x88] sm:$0xff]  }
 0x218   :  { %2652 = vmatpush1.bf16.msra.mxu0 %v4084_v23  ;;  %2734 = vmatpush1.bf16.msra.mxu1 %v4087_v24  ;;  %v4165_v23 = vld [vmem:[#allocation8 + $0xd0] sm:$0xff]  }
 0x219   :  { %2653 = vmatprep.subr.bf16.mxu0 %v4092_v25  ;;  %2735 = vmatprep.subr.bf16.mxu1 %v4095_v26  ;;  %v4166_v24 = vld [vmem:[#allocation8 + $0x10] sm:$0xff]   ;;  %v4168_v26 = vld [vmem:[#allocation8 + $0x58] sm:$0xff]  }
 0x21a   :  { %v4167_v25 = vld [vmem:[#allocation8 + $0x90] sm:$0xff]  }
 0x21c   :  { %2654 = vmatpush1.bf16.msra.mxu0 %v4090_v27  ;;  %2736 = vmatpush1.bf16.msra.mxu1 %v4093_v28  ;;  %v4169_v27 = vld [vmem:[#allocation8 + $0xd8] sm:$0xff]  }
 0x21d   :  { %2655 = vmatprep.subr.bf16.mxu0 %v4098_v29  ;;  %2737 = vmatprep.subr.bf16.mxu1 %v4101_v30  ;;  %v4170_v28 = vld [vmem:[#allocation8 + $0x18] sm:$0xff]   ;;  %v4172_v30 = vld [vmem:[#allocation8 + $0x60] sm:$0xff]  }
 0x21e   :  { %v4171_v29 = vld [vmem:[#allocation8 + $0x98] sm:$0xff]  }
 0x220   :  { %2656 = vmatpush1.bf16.msra.mxu0 %v4096_v31  ;;  %2738 = vmatpush1.bf16.msra.mxu1 %v4099_v32  ;;  %v4173_v31 = vld [vmem:[#allocation8 + $0xe0] sm:$0xff]  }
 0x221   :  { %2657 = vmatprep.subr.bf16.mxu0 %v4104_v33  ;;  %2739 = vmatprep.subr.bf16.mxu1 %v4107_v34  ;;  %v4174_v32 = vld [vmem:[#allocation8 + $0x20] sm:$0xff]   ;;  %v4176_v34 = vld [vmem:[#allocation8 + $0x68] sm:$0xff]  }
 0x222   :  { %v4175_v33 = vld [vmem:[#allocation8 + $0xa0] sm:$0xff]  }
 0x224   :  { %2658 = vmatpush1.bf16.msra.mxu0 %v4102_v35  ;;  %2740 = vmatpush1.bf16.msra.mxu1 %v4105_v36  ;;  %v4177_v35 = vld [vmem:[#allocation8 + $0xe8] sm:$0xff]  }
 0x225   :  { %2659 = vmatprep.subr.bf16.mxu0 %v4110_v37  ;;  %2741 = vmatprep.subr.bf16.mxu1 %v4113_v38  ;;  %v4178_v36 = vld [vmem:[#allocation8 + $0x28] sm:$0xff]   ;;  %v4180_v38 = vld [vmem:[#allocation8 + $0x70] sm:$0xff]  }
 0x226   :  { %v4179_v37 = vld [vmem:[#allocation8 + $0xa8] sm:$0xff]  }
 0x228   :  { %2660 = vmatpush1.bf16.msra.mxu0 %v4108_v39  ;;  %2742 = vmatpush1.bf16.msra.mxu1 %v4111_v40  ;;  %v4181_v39 = vld [vmem:[#allocation8 + $0xf0] sm:$0xff]  }
 0x229   :  { %2661 = vmatprep.subr.bf16.mxu0 %v4116_v41  ;;  %2743 = vmatprep.subr.bf16.mxu1 %v4119_v42  ;;  %v4182_v40 = vld [vmem:[#allocation8 + $0x30] sm:$0xff]   ;;  %v4184_v42 = vld [vmem:[#allocation8 + $0x78] sm:$0xff]  }
 0x22a   :  { %v4183_v41 = vld [vmem:[#allocation8 + $0xb0] sm:$0xff]  }
 0x22c   :  { %2662 = vmatpush1.bf16.msra.mxu0 %v4114_v43  ;;  %2744 = vmatpush1.bf16.msra.mxu1 %v4117_v44  ;;  %v4185_v43 = vld [vmem:[#allocation8 + $0xf8] sm:$0xff]  }
 0x22d   :  { %2663 = vmatprep.subr.bf16.mxu0 %v4122_v45  ;;  %2745 = vmatprep.subr.bf16.mxu1 %v4125_v51  ;;  %v4186_v44 = vld [vmem:[#allocation8 + $0x38] sm:$0xff]   ;;  %v1940_v51 = vld [vmem:[%s4478_s4] sm:$0xf] }
 0x22e   :  { %v4187_v45 = vld [vmem:[#allocation8 + $0xb8] sm:$0xff]  }
 0x230   :  { %2664 = vmatpush1.bf16.msra.mxu0 %v4120_v52  ;;  %2746 = vmatpush1.bf16.msra.mxu1 %v4123_v53  ;;  %v1945_v52 = vrot.slane %v1940_v51, %v313_v47  ;;  %v1953_v53 = vrot.slane %v1940_v51, %v321_v63 }
 0x231   :  { %2665 = vmatprep.subr.bf16.mxu0 %v4128_v54  ;;  %2747 = vmatprep.subr.bf16.mxu1 %v4131_v56  ;;  %v1949_v54 = vrot.slane %v1940_v51, %v317_v49  ;;  %v1957_v56 = vrot.slane %v1940_v51, %v325_v50 }
 0x234   :  { %2666 = vmatpush1.bf16.msra.mxu0 %v4126_v57  ;;  %2748 = vmatpush1.bf16.msra.mxu1 %v4129_v58 }
 0x235   :  { %2667 = vmatprep.subr.bf16.mxu0 %v4134_v59  ;;  %2749 = vmatprep.subr.bf16.mxu1 %v4137_v60 }
 0x238   :  { %2668 = vmatpush1.bf16.msra.mxu0 %v4132_v61  ;;  %2750 = vmatpush1.bf16.msra.mxu1 %v4135_v62 }
 0x239   :  { %2669 = vmatprep.subr.bf16.mxu0 %v4140_v0  ;;  %2751 = vmatprep.subr.bf16.mxu1 %v4143_v1 }
 0x23c   :  { %2670 = vmatpush1.bf16.msra.mxu0 %v4138_v2  ;;  %2752 = vmatpush1.bf16.msra.mxu1 %v4141_v3 }
 0x23d   :  { %2671 = vmatprep.subr.bf16.mxu0 %v4146_v5  ;;  %2753 = vmatprep.subr.bf16.mxu1 %v4149_v6 }
 0x240   :  { %2672 = vmatpush1.bf16.msra.mxu0 %v4144_v7  ;;  %2754 = vmatpush1.bf16.msra.mxu1 %v4147_v8 }
 0x241   :  { %2673 = vmatprep.subr.bf16.mxu0 %v4152_v10  ;;  %2755 = vmatprep.subr.bf16.mxu1 %v4155_v12  ;;  %v3494_v12 = vld [vmem:[%s4480_s6] ss:$0 sm:$0xff] }
 0x244   :  { %2674 = vmatpush1.bf16.msra.mxu0 %v4150_v13  ;;  %2756 = vmatpush1.bf16.msra.mxu1 %v4153_v14 }
 0x245   :  { %3527 = vmatprep.subr.bf16.mxu0 %v4156_v48  ;;  %3549 = vmatprep.subr.bf16.mxu1 %v4157_v16 }
 0x247   :  { %2676 = vmatmul.mubr.bf16.vlgmr.msra.gmra.mrb[4].mxu0 %v1810_v19  ;;  %2758 = vmatmul.mubr.bf16.vlgmr.msra.gmra.mrb[4].mxu1 %v1810_v19 }
 0x248   :  { %3528 = vmatpush3.bf16.msra.mxu0 %v4158_v17  ;;  %3550 = vmatpush3.bf16.msra.mxu1 %v4159_v18 }
 0x249   :  { %3529 = vmatprep.subr.bf16.mxu0 %v4160_v55  ;;  %3551 = vmatprep.subr.bf16.mxu1 %v4161_v20 }
 0x24c   :  { %3530 = vmatpush3.bf16.msra.mxu0 %v4162_v21  ;;  %3552 = vmatpush3.bf16.msra.mxu1 %v4163_v22 }
 0x24d   :  { %3531 = vmatprep.subr.bf16.mxu0 %v4164_v11  ;;  %3553 = vmatprep.subr.bf16.mxu1 %v4165_v23 }
 0x250   :  { %3532 = vmatpush3.bf16.msra.mxu0 %v4166_v24  ;;  %3554 = vmatpush3.bf16.msra.mxu1 %v4167_v25 }
 0x251   :  { %3533 = vmatprep.subr.bf16.mxu0 %v4168_v26  ;;  %3555 = vmatprep.subr.bf16.mxu1 %v4169_v27 }
 0x254   :  { %3534 = vmatpush3.bf16.msra.mxu0 %v4170_v28  ;;  %3556 = vmatpush3.bf16.msra.mxu1 %v4171_v29 }
 0x255   :  { %3535 = vmatprep.subr.bf16.mxu0 %v4172_v30  ;;  %3557 = vmatprep.subr.bf16.mxu1 %v4173_v31 }
 0x258   :  { %3536 = vmatpush3.bf16.msra.mxu0 %v4174_v32  ;;  %3558 = vmatpush3.bf16.msra.mxu1 %v4175_v33 }
 0x259   :  { %3537 = vmatprep.subr.bf16.mxu0 %v4176_v34  ;;  %3559 = vmatprep.subr.bf16.mxu1 %v4177_v35 }
 0x25c   :  { %3538 = vmatpush3.bf16.msra.mxu0 %v4178_v36  ;;  %3560 = vmatpush3.bf16.msra.mxu1 %v4179_v37 }
 0x25d   :  { %3539 = vmatprep.subr.bf16.mxu0 %v4180_v38  ;;  %3561 = vmatprep.subr.bf16.mxu1 %v4181_v39 }
 0x260   :  { %3540 = vmatpush3.bf16.msra.mxu0 %v4182_v40  ;;  %3562 = vmatpush3.bf16.msra.mxu1 %v4183_v41 }
 0x261   :  { %3541 = vmatprep.subr.bf16.mxu0 %v4184_v42  ;;  %3563 = vmatprep.subr.bf16.mxu1 %v4185_v43 }
 0x264   :  { %3542 = vmatpush3.bf16.msra.mxu0 %v4186_v44  ;;  %3564 = vmatpush3.bf16.msra.mxu1 %v4187_v45 }
 0x31a   :  { %v2677_v57 = vpop.f32.mrb[4].mxu0  ;;  %v2759_v58 = vpop.f32.mrb[4].mxu1 }
 0x31b   :  { %v3575_v59 = vadd.f32 %v2677_v57, %v1945_v52  ;;  %v3577_v60 = vadd.f32 %v2759_v58, %v1953_v53  ;;  %v2679_v61 = vpop.f32.mrb[5].mxu0  ;;  %v2761_v62 = vpop.f32.mrb[5].mxu1 }
 0x31c   :  { %v3576_v0 = vadd.f32 %v2679_v61, %v1949_v54  ;;  %v3578_v1 = vadd.f32 %v2761_v62, %v1957_v56  ;;  %v2681_v2 = vpop.f32.mrb[6].mxu0  ;;  %v2763_v3 = vpop.f32.mrb[6].mxu1 }
 0x31d   :  { %v2766_v47 = vmax.f32 %v3575_v59, 0.0  ;;  %v2768_v4 = vmax.f32 %v3577_v60, 0.0  ;;  %v2682_v5 = vpop.f32.mrb[7].mxu0  ;;  %v2764_v63 = vpop.f32.mrb[7].mxu1 }
 0x31e   :  { %v2767_v6 = vmax.f32 %v3576_v0, 0.0  ;;  %v2769_v7 = vmax.f32 %v3578_v1, 0.0 }
 0x31f   :  { %v2770_v46 = vpack.c.bf16 %v2766_v47, %v2766_v47  ;;  %v2772_v50 = vpack.c.bf16 %v2768_v4, %v2768_v4 }
 0x320   :  { %v2771_v49 = vpack.c.bf16 %v2767_v6, %v2767_v6  ;;  %v2773_v8 = vpack.c.bf16 %v2769_v7, %v2769_v7 }
 0x322   :  { %3069 = vmatprep.mubr.bf16.mxu0 %v2771_v49  ;;  %3109 = vmatprep.mubr.bf16.mxu1 %v2773_v8 }
 0x323   :  { %3070 = vmatmul.mubr.bf16.vlgmr.msra.gmra.mrb[8].mxu0 %v2770_v46  ;;  %3110 = vmatmul.mubr.bf16.vlgmr.msra.gmra.mrb[8].mxu1 %v2772_v50 }
 0x3f6   :  { %v3543_v9 = vpop.f32.mrb[8].mxu0  ;;  %v3565_v10 = vpop.f32.mrb[8].mxu1 }
 0x3f7   :  { %v3544_v13 = vpop.f32.mrb[9].mxu0  ;;  %v3566_v14 = vpop.f32.mrb[9].mxu1 }
 0x3f8   :  { %v3545_v15 = vadd.f32 %v3544_v13, %v3543_v9  ;;  %v3567_v48 = vadd.f32 %v3566_v14, %v3565_v10  ;;  %v3546_v16 = vpop.f32.mrb[10].mxu0  ;;  %v3568_v17 = vpop.f32.mrb[10].mxu1 }
 0x3f9   :  { %v3547_v18 = vpop.f32.mrb[11].mxu0  ;;  %v3569_v19 = vpop.f32.mrb[11].mxu1 }
 0x3fa   :  { %v3072_v55 = vadd.f32 %v3545_v15, %v3494_v12 }
 0x3fc   :  { %v3112_v20 = vadd.f32 %v3567_v48, %v3072_v55 }
 0x3fe   :  { %3117 = vst [vmem:[#allocation10] sm:$0xff] %v3112_v20 }
 0x3ff   :  { %4287 = shalt.err (!%p4284_p8)
}
 0x400   :  { %s4288_s10 = scalar_lea.hbm %s4481_s7, 128 }
 0x401   :  { %p4289_p9 = scmp.ne.s32.totalorder %s4481_s7, %s4288_s10  ;;  %p4292_p10 = scmp.lt.u32.totalorder %s4288_s10, %s4481_s7 }
 0x403   :  { %p4294_p11 = pnand %p4292_p10, %p4289_p9 }
 0x405   :  { %4297 = shalt.err (!%p4294_p11)
}
 0x406   :  { %3127 = dma.vmem_to_hbm [thread:$0]  %s3125_s30, 128, %s4481_s7, [#allocation4]  }
 0x407   :  { %4304 = dma.done.wait [#allocation4], 128  }
 0x408   :  { %4305 = vsyncadd [#allocation4], 4294967168 }
 0x409   :  { %3131 = vsyncpa [#allocation3], 1 }
 0x40a   :  { %3132 = vsyncpa [#allocation6], 1 }
 0x40b   :  { %3133 = vsyncpa [#allocation9], 1 }
 0x40c   :  { %3134 = vsyncpa [#allocation4], 1 }

</bundles_post_ra>
